<compile_context>
chip_gen: v6e
topology: v6e:2x2x1
jax: 0.10.0
libtpu: 0.0.40
codegen_flags: <defaults>
</compile_context>

<pallas_src>
import functools

import jax
import jax.numpy as jnp
from jax.experimental import pallas as pl
from jax.experimental.pallas import tpu as pltpu


_SQRT_2_OVER_PI = 0.7978845608028654


def _gelu_tanh(x):
    # PyTorch nn.GELU(approximate='tanh'):
    #   0.5 * x * (1 + tanh(sqrt(2/pi) * (x + 0.044715 * x**3)))
    # Kept in f32 (MXU already emits f32; v5e has no bf16 VPU/EUP).  tanh goes
    # to the EUP, which has its own bundle slot.
    return 0.5 * x * (1.0 + jnp.tanh(_SQRT_2_OVER_PI * (x + 0.044715 * x * x * x)))


def _mlp_kernel(x_ref, w1_ref, b1_ref, w2_ref, b2_ref, o_ref):
    # x_ref : (tm, C)  native-dtype row tile (cast to bf16 in-kernel)
    # w1_ref: (C, H)   bf16, VMEM-resident (constant index_map -> fetched once)
    # b1_ref: (1, H)   bf16
    # w2_ref: (H, C)   bf16, VMEM-resident
    # b2_ref: (1, C)   bf16
    # o_ref : (tm, C)  output tile (lane-dense: C is a multiple of 128)
    x = x_ref[...].astype(jnp.bfloat16)
    # c_fc on the MXU: bf16 x bf16 -> f32.
    h = jnp.dot(x, w1_ref[...], preferred_element_type=jnp.float32)
    h = _gelu_tanh(h + b1_ref[...].astype(jnp.float32))
    # c_proj on the MXU, bias folded into the single epilogue add.
    y = jnp.dot(h.astype(jnp.bfloat16), w2_ref[...],
                preferred_element_type=jnp.float32)
    y = y + b2_ref[...].astype(jnp.float32)
    o_ref[...] = y.astype(o_ref.dtype)
    # TODO(synk): training-mode dropout (pltpu.prng_seed + prng_random_bits
    # mask) is not emitted; this is the eval-mode / p=0 identity.


def _vmem_limit_bytes():
    # Per-generation VMEM budget: physical capacity minus headroom for Mosaic
    # internal scratch.  v7x: 64 -> 48 MiB, v5e/v6e: 128 -> 112 MiB.
    try:
        cap = pltpu.get_tpu_info().vmem_capacity_bytes
    except Exception:  # query unavailable: conservative default
        cap = 64 * 1024 * 1024
    return int(max(32 * 1024 * 1024, cap - 16 * 1024 * 1024))


@functools.partial(jax.jit, static_argnames=("tm", "out_dtype"))
def mlp_forward(x, w1, b1, w2, b2, *, tm=256, out_dtype=None):
    """x: (B, T, C) -> (B, T, C). Fused GPT-2 MLP in one pallas_call.

    tm: row tile (multiple of 8; 128/256 recommended -- sweep this).
    out_dtype: output dtype (defaults to x.dtype; pass jnp.bfloat16 to halve
      output writeback bytes when the downstream consumer accepts bf16).
    """
    B, T, C = x.shape
    H = w1.shape[1]  # 4*C
    assert w1.shape == (C, H) and w2.shape == (H, C)
    assert b1.shape == (1, H) and b2.shape == (1, C)
    assert C % 128 == 0 and H % 128 == 0, "C and 4C must be multiples of 128"
    assert tm % 8 == 0, "tm must be a multiple of 8"

    out_dtype = x.dtype if out_dtype is None else out_dtype
    M = B * T

    # v7x shards the "parallel" row axis across its 2 TensorCores: make sure
    # there are at least 2 row tiles whenever the row count allows it.
    tm_eff = min(tm, max(128, 128 * pl.cdiv(pl.cdiv(M, 2), 128)))
    n_tiles = pl.cdiv(M, tm_eff)
    Mp = n_tiles * tm_eff

    x2 = x.reshape(M, C)
    if Mp != M:
        # Padded (zero) rows flow through gelu(b1) @ W2 + b2 and are sliced
        # off below -- no cross-row reduction, so this is safe.
        x2 = jnp.pad(x2, ((0, Mp - M), (0, 0)))

    # bf16 MXU operands (f32 accumulation inside the kernel).  These casts are
    # no-ops when the caller already passes bf16 weights (recommended: cast
    # once at load time, outside the per-call path).
    w1b = w1.astype(jnp.bfloat16)
    b1b = b1.astype(jnp.bfloat16)
    w2b = w2.astype(jnp.bfloat16)
    b2b = b2.astype(jnp.bfloat16)

    vmem_limit = _vmem_limit_bytes()
    # Rough VMEM plan: resident bf16 weights (double-buffered by the default
    # pipeline) + double-buffered x/out row tiles + the (tm, H) f32
    # intermediate.  If this does not fit, the streamed-weight fallback is
    # required (see TODO at the top of the file).
    weight_vmem = 2 * 2 * 2 * C * H                       # 2 weights x 2 bufs x bf16
    work_vmem = (2 * tm_eff * C
                 * (x.dtype.itemsize + jnp.dtype(out_dtype).itemsize)
                 + tm_eff * H * 4)
    assert weight_vmem + work_vmem + (8 << 20) <= vmem_limit, (
        "bf16 weights do not fit the per-core VMEM budget; the streamed-weight"
        " (hidden-axis tiled) variant is required for this model size")

    flops = 4 * Mp * C * H                                # two matmuls, 2*M*C*H each
    bytes_accessed = (
        Mp * C * x.dtype.itemsize                         # x, read once
        + (C * H + H * C + H + C) * 2                     # weights/biases, read once
        + Mp * C * jnp.dtype(out_dtype).itemsize)         # output
    cost = pl.CostEstimate(flops=flops, transcendentals=Mp * H,
                           bytes_accessed=bytes_accessed)

    out2 = pl.pallas_call(
        _mlp_kernel,
        out_shape=jax.ShapeDtypeStruct((Mp, C), out_dtype),
        grid_spec=pltpu.PrefetchScalarGridSpec(
            num_scalar_prefetch=0,
            grid=(n_tiles,),
            in_specs=[
                pl.BlockSpec((tm_eff, C), lambda i: (i, 0)),  # x row tile
                # Whole-array blocks with constant index_maps: the block index
                # never changes, so Pallas fetches each exactly once per core
                # and keeps it resident in VMEM (no per-row-tile re-stream).
                pl.BlockSpec((C, H), lambda i: (0, 0)),       # W1 (resident)
                pl.BlockSpec((1, H), lambda i: (0, 0)),       # b1
                pl.BlockSpec((H, C), lambda i: (0, 0)),       # W2 (resident)
                pl.BlockSpec((1, C), lambda i: (0, 0)),       # b2
            ],
            out_specs=pl.BlockSpec((tm_eff, C), lambda i: (i, 0)),
        ),
        compiler_params=pltpu.CompilerParams(
            dimension_semantics=("parallel",),   # row tiles are independent
            vmem_limit_bytes=vmem_limit,
        ),
        cost_estimate=cost,
    )(x2, w1b, b1b, w2b, b2b)

    return out2[:M].reshape(B, T, C)


def mlp_reference(x, w1, b1, w2, b2):
    # Pure-JAX reference with the same bf16 operand rounding / f32 accumulation
    # as the kernel.
    xb = x.astype(jnp.bfloat16)
    h = jnp.dot(xb, w1.astype(jnp.bfloat16),
                preferred_element_type=jnp.float32)
    h = _gelu_tanh(h + b1.astype(jnp.bfloat16).astype(jnp.float32))
    y = jnp.dot(h.astype(jnp.bfloat16), w2.astype(jnp.bfloat16),
                preferred_element_type=jnp.float32)
    y = y + b2.astype(jnp.bfloat16).astype(jnp.float32)
    return y.astype(x.dtype)


if __name__ == "__main__":
    # Small GPT-2-like config with lane-dense dims: n_embd=128, hidden=512.
    B, T, C = 4, 64, 128
    H = 4 * C

    key = jax.random.PRNGKey(0)
    kx, k1, k2, k3, k4 = jax.random.split(key, 5)

    x = jax.random.normal(kx, (B, T, C), dtype=jnp.float32)
    # Deterministic param init (roughly matching nn.Linear's scale).
    w1 = jax.random.normal(k1, (C, H), dtype=jnp.float32) * (1.0 / C ** 0.5)
    b1 = jax.random.normal(k2, (1, H), dtype=jnp.float32) * 0.01
    w2 = jax.random.normal(k3, (H, C), dtype=jnp.float32) * (1.0 / H ** 0.5)
    b2 = jax.random.normal(k4, (1, C), dtype=jnp.float32) * 0.01

    # Cache bf16 weights once, outside the per-call path (perf-review item):
    # the kernel-side casts become no-ops.
    w1b, b1b = w1.astype(jnp.bfloat16), b1.astype(jnp.bfloat16)
    w2b, b2b = w2.astype(jnp.bfloat16), b2.astype(jnp.bfloat16)

    # M = 256 rows -> tm_eff = 128 -> 2 row tiles (exercises the grid / both
    # v7x TensorCores).
    y = mlp_forward(x, w1b, b1b, w2b, b2b)
    jax.block_until_ready(y)

    y_ref = mlp_reference(x, w1, b1, w2, b2)
    assert y.shape == (B, T, C)
    max_err = float(jnp.max(jnp.abs(y - y_ref)))
    assert jnp.allclose(y, y_ref, atol=2e-2, rtol=2e-2), (
        f"mismatch vs reference, max abs err = {max_err}")

    print("KERNEL_OK")
</pallas_src>

<mosaic_0001>
module attributes {stable_mosaic.version = 11 : i64} {
  func.func @_mlp_kernel(%arg0: i32, %arg1: memref<128x128xf32, #tpu.memory_space<vmem>>, %arg2: memref<128x512xbf16, #tpu.memory_space<vmem>>, %arg3: memref<1x512xbf16, #tpu.memory_space<vmem>>, %arg4: memref<512x128xbf16, #tpu.memory_space<vmem>>, %arg5: memref<1x128xbf16, #tpu.memory_space<vmem>>, %arg6: memref<128x128xf32, #tpu.memory_space<vmem>>) attributes {dimension_semantics = [#tpu.dimension_semantics<parallel>], iteration_bounds = array<i64: 2>, scalar_prefetch = 0 : i64, scratch_operands = 0 : i64, tpu.core_type = #tpu.core_type<tc>, window_params = [{transform_indices = @transform_0, window_bounds = array<i64: 128, 128>}, {pipeline_mode = #tpu.pipeline_mode<synchronous>, transform_indices = @transform_1, window_bounds = array<i64: 128, 512>}, {pipeline_mode = #tpu.pipeline_mode<synchronous>, transform_indices = @transform_2, window_bounds = array<i64: 1, 512>}, {pipeline_mode = #tpu.pipeline_mode<synchronous>, transform_indices = @transform_3, window_bounds = array<i64: 512, 128>}, {pipeline_mode = #tpu.pipeline_mode<synchronous>, transform_indices = @transform_4, window_bounds = array<i64: 1, 128>}, {transform_indices = @transform_5, window_bounds = array<i64: 128, 128>}]} {
    %c0 = arith.constant 0 : index
    %c0_0 = arith.constant 0 : index
    %0 = vector.load %arg1[%c0, %c0_0] : memref<128x128xf32, #tpu.memory_space<vmem>>, vector<128x128xf32>
    %1 = arith.truncf %0 : vector<128x128xf32> to vector<128x128xbf16>
    %c0_1 = arith.constant 0 : index
    %c0_2 = arith.constant 0 : index
    %2 = vector.load %arg2[%c0_1, %c0_2] : memref<128x512xbf16, #tpu.memory_space<vmem>>, vector<128x512xbf16>
    %cst = arith.constant dense<0.000000e+00> : vector<128x512xf32>
    %3 = tpu.matmul %1, %2, %cst {dimension_numbers = #tpu.dot_dimension_numbers<[1], [0], [0], [1], [0, 0, 1, 1], [], []>} : vector<128x128xbf16>, vector<128x512xbf16>, vector<128x512xf32> -> vector<128x512xf32>
    %c0_3 = arith.constant 0 : index
    %c0_4 = arith.constant 0 : index
    %4 = vector.load %arg3[%c0_3, %c0_4] : memref<1x512xbf16, #tpu.memory_space<vmem>>, vector<1x512xbf16>
    %5 = arith.extf %4 : vector<1x512xbf16> to vector<1x512xf32>
    %6 = vector.broadcast %5 : vector<1x512xf32> to vector<128x512xf32>
    %7 = arith.addf %3, %6 : vector<128x512xf32>
    %cst_5 = arith.constant 5.000000e-01 : f32
    %8 = vector.broadcast %cst_5 : f32 to vector<128x512xf32>
    %9 = arith.mulf %8, %7 : vector<128x512xf32>
    %cst_6 = arith.constant 4.471500e-02 : f32
    %10 = vector.broadcast %cst_6 : f32 to vector<128x512xf32>
    %11 = arith.mulf %10, %7 : vector<128x512xf32>
    %12 = arith.mulf %11, %7 : vector<128x512xf32>
    %13 = arith.mulf %12, %7 : vector<128x512xf32>
    %14 = arith.addf %7, %13 : vector<128x512xf32>
    %cst_7 = arith.constant 0.797884583 : f32
    %15 = vector.broadcast %cst_7 : f32 to vector<128x512xf32>
    %16 = arith.mulf %15, %14 : vector<128x512xf32>
    %17 = math.tanh %16 : vector<128x512xf32>
    %cst_8 = arith.constant 1.000000e+00 : f32
    %18 = vector.broadcast %cst_8 : f32 to vector<128x512xf32>
    %19 = arith.addf %18, %17 : vector<128x512xf32>
    %20 = arith.mulf %9, %19 : vector<128x512xf32>
    %21 = arith.truncf %20 : vector<128x512xf32> to vector<128x512xbf16>
    %c0_9 = arith.constant 0 : index
    %c0_10 = arith.constant 0 : index
    %22 = vector.load %arg4[%c0_9, %c0_10] : memref<512x128xbf16, #tpu.memory_space<vmem>>, vector<512x128xbf16>
    %cst_11 = arith.constant dense<0.000000e+00> : vector<128x128xf32>
    %23 = tpu.matmul %21, %22, %cst_11 {dimension_numbers = #tpu.dot_dimension_numbers<[1], [0], [0], [1], [0, 0, 1, 1], [], []>} : vector<128x512xbf16>, vector<512x128xbf16>, vector<128x128xf32> -> vector<128x128xf32>
    %c0_12 = arith.constant 0 : index
    %c0_13 = arith.constant 0 : index
    %24 = vector.load %arg5[%c0_12, %c0_13] : memref<1x128xbf16, #tpu.memory_space<vmem>>, vector<1x128xbf16>
    %25 = arith.extf %24 : vector<1x128xbf16> to vector<1x128xf32>
    %26 = vector.broadcast %25 : vector<1x128xf32> to vector<128x128xf32>
    %27 = arith.addf %23, %26 : vector<128x128xf32>
    %c0_14 = arith.constant 0 : index
    %c0_15 = arith.constant 0 : index
    %28 = vector.load %arg6[%c0_14, %c0_15] : memref<128x128xf32, #tpu.memory_space<vmem>>, vector<128x128xf32>
    tpu.vector_store %arg6[%c0_14, %c0_15], %27 {strides = array<i32>} : memref<128x128xf32, #tpu.memory_space<vmem>>, vector<128x128xf32>,
    return
  }
  func.func @transform_0(%arg0: i32) -> (i32, i32) {
    %c0_i32 = arith.constant 0 : i32
    %c0_i32_0 = arith.constant 0 : i32
    return %arg0, %c0_i32 : i32, i32
  }
  func.func @transform_1(%arg0: i32) -> (i32, i32) {
    %c0_i32 = arith.constant 0 : i32
    %c0_i32_0 = arith.constant 0 : i32
    %c0_i32_1 = arith.constant 0 : i32
    return %c0_i32, %c0_i32_0 : i32, i32
  }
  func.func @transform_2(%arg0: i32) -> (i32, i32) {
    %c0_i32 = arith.constant 0 : i32
    %c0_i32_0 = arith.constant 0 : i32
    %c0_i32_1 = arith.constant 0 : i32
    return %c0_i32, %c0_i32_0 : i32, i32
  }
  func.func @transform_3(%arg0: i32) -> (i32, i32) {
    %c0_i32 = arith.constant 0 : i32
    %c0_i32_0 = arith.constant 0 : i32
    %c0_i32_1 = arith.constant 0 : i32
    return %c0_i32, %c0_i32_0 : i32, i32
  }
  func.func @transform_4(%arg0: i32) -> (i32, i32) {
    %c0_i32 = arith.constant 0 : i32
    %c0_i32_0 = arith.constant 0 : i32
    %c0_i32_1 = arith.constant 0 : i32
    return %c0_i32, %c0_i32_0 : i32, i32
  }
  func.func @transform_5(%arg0: i32) -> (i32, i32) {
    %c0_i32 = arith.constant 0 : i32
    %c0_i32_0 = arith.constant 0 : i32
    return %arg0, %c0_i32 : i32, i32
  }
}

</mosaic_0001>

<bundles_post_ra>
// kernel: mlp_forward.1
= control target key start
LH: loop header
LB: loop body
LE: loop exit
PB: predicated region body
PF: predicated region fallthrough
CT: control target
= control target key end

     0   :  { %10 = vsyncpa [#allocation3], 0  ;;  %s3661_s0 = inlined_call_operand.hbm [shape: f32[256,128], index: 0, kind: input, shape index: {}]   ;;  %s3662_s1 = inlined_call_operand.hbm [shape: bf16[128,512], index: 1, kind: input, shape index: {}]   ;;  %s3663_s2 = inlined_call_operand.vmem [shape: bf16[1,512], index: 2, kind: input, shape index: {}]   ;;  %s3664_s3 = inlined_call_operand.hbm [shape: bf16[512,128], index: 3, kind: input, shape index: {}]   ;;  %s3665_s4 = inlined_call_operand.vmem [shape: bf16[1,128], index: 4, kind: input, shape index: {}]   ;;  %s3666_s5 = inlined_call_operand.hbm [shape: f32[256,128], index: 5, kind: output, shape index: {}]  }
   0x1   :  { %12 = vsyncpa [#allocation3 + $0x1], 0 }
   0x2   :  { %13 = vsyncpa [#allocation6], 0 }
   0x3   :  { %14 = vsyncpa [#allocation4], 0 }
   0x4   :  { %16 = vsyncpa [#allocation4 + $0x1], 0  ;;  %s2631_s18 = smov 0   ;;  %s2633_s19 = smov 0  }
   0x5   :  { %s2635_s20 = smov 0   ;;  %s2637_s21 = smov 0  }
   0x6 LB: > { %s2652_s22 = sadd.s32 4294967295, %s2586_s21   ;;  %s1942_s23 = sadd.s32 4294967294, %s2586_s21   ;;  %s2586_s21 = sphi %s2637_s21, %s3874_s21   ;;  %s2582_s20 = sphi %s2635_s20, %s3873_s20   ;;  %s2578_s19 = sphi %s2633_s19, %s3872_s19   ;;  %s2574_s18 = sphi %s2631_s18, %s3871_s18  }
   0x7   : > { %p42_p0 = scmp.ne.s32.totalorder %s2578_s19, %s2574_s18  ;;  %p3667_p1 = scmp.eq.s32.totalorder %s2652_s22, 0 }
   0x8   : > { %p156_p3 = scmp.eq.s32.totalorder %s1942_s23, 1  ;;  %p1943_p5 = scmp.ge.s32.totalorder %s2586_s21, 1 }
   0x9   : > { %p2661_p4 = por %p3667_p1, %p42_p0  ;;  %p163_p7 = scmp.lt.s32.totalorder %s2586_s21, 3 }
   0xa   : > { %p2666_p6 = por %p156_p3, %p42_p0  ;;  %s2588_s27 = smov [#allocation5]  }
   0xb   : > { %s3726_s24 = scalar_select %p2661_p4, 1, 0 }
   0xc   : > { %s3727_s25 = scalar_select %p2666_p6, 1, 0 }
   0xd   : > { %p2671_p8 = pnand %p1943_p5, %p163_p7  ;;  %s175_s28 = sshll.u32 %s2588_s27, 4  ;;  %s176_s28 = int_to_ptr.vmem [resolvable:$true] %s175_s28 }
   0xe   : > { %s2589_s30 = smov [#allocation7]   ;;  %s2449_s7 = scalar_lea.vmem %s176_s28, 4096 }
   0xf   : > { %s3728_s26 = scalar_select %p2671_p8, 1, 0 }
  0x10   : > { %p2166_p9 = pneg %p2671_p8  ;;  %s191_s6 = sshll.u32 %s2589_s30, 4  ;;  %s192_s6 = int_to_ptr.vmem [resolvable:$true] %s191_s6 }
  0x11   : > { %p2450_p13 = scmp.ne.s32.totalorder %s176_s28, %s2449_s7  ;;  %p2457_p5 = scmp.lt.s32.totalorder %s176_s28, %s176_s28 }
  0x12   : > { %p2680_p11 = pnand %p2166_p9, %p3667_p1  ;;  %p2458_p7 = scmp.lt.s32.totalorder %s2449_s7, %s2449_s7 }
  0x14   : > { %p2440_p12 = pneg %p2680_p11  ;;  %p2459_p10 = por %p2458_p7, %p2457_p5 }
  0x16   : > { %p2452_p0 = pnand %p2450_p13, %p2440_p12 }
  0x18   : > { %p2453_p3 = pneg %p2452_p0 }
  0x1a   : > { %p2460_p9 = pnand %p2459_p10, %p2453_p3 }
  0x1c   : > { %2463 = shalt.err (!%p2460_p9)
}
  0x1d   : > { %s2590_s8 = smov 256   ;;  %s2591_s9 = smov 16  }
  0x1e   : > { %2169 = dma.hbm_to_vmem [thread:$0]  (!%p2680_p11), %s3662_s1, 4096, %s176_s28, [#allocation6], %s2590_s8, %s2590_s8, %s2591_s9  }
  0x1f   : > { %s2475_s12 = scalar_lea.vmem %s192_s6, 4096  ;;  %p2483_p2 = scmp.lt.s32.totalorder %s192_s6, %s192_s6 }
  0x20   : > { %p2476_p1 = scmp.ne.s32.totalorder %s192_s6, %s2475_s12  ;;  %p2484_p6 = scmp.lt.s32.totalorder %s2475_s12, %s2475_s12 }
  0x22   : > { %p2478_p13 = pnand %p2476_p1, %p2440_p12  ;;  %p2485_p5 = por %p2484_p6, %p2483_p2 }
  0x24   : > { %p2479_p0 = pneg %p2478_p13 }
  0x26   : > { %p2486_p10 = pnand %p2485_p5, %p2479_p0 }
  0x28   : > { %2489 = shalt.err (!%p2486_p10)
}
  0x29   : > { %s2592_s13 = smov 64   ;;  %s2593_s14 = smov 4  }
  0x2a   : > { %2172 = dma.hbm_to_vmem [thread:$0]  (!%p2680_p11), %s3664_s3, 4096, %s192_s6, [#allocation6], %s2592_s13, %s2592_s13, %s2593_s14  }
  0x2b   : > { %s2703_s17 = sadd.s32 1, %s2586_s21   ;;  %s29_s27 = sadd.s32 1, %s2582_s20 }
  0x2c   : > { %s26_s23 = ssub.s32 %s2586_s21, %s2703_s17  ;;  %p36_p2 = scmp.ne.s32.totalorder %s2582_s20, %s2578_s19 }
  0x2d   : > { %p27_p1 = scmp.eq.s32.totalorder %s26_s23, 0  ;;  %p37_p6 = scmp.eq.s32.totalorder %s2586_s21, 0 }
  0x2e   : > { %p3730_p3 = scmp.eq.s32.totalorder %s2652_s22, 1  ;;  %p2183_p9 = scmp.lt.s32.totalorder %s2586_s21, 2 }
  0x2f   : > { %s2712_s28 = scalar_select %p27_p1, %s2582_s20, %s29_s27  }
  0x30   : > { %p38_p12 = por %p37_p6, %p36_p2  ;;  %p2716_p7 = por %p3730_p3, %p36_p2 }
  0x31   : > { %s208_s29 = sand.u32 1, %s2582_s20   ;;  %s2024_s6 = sshll.u32 %s2586_s21, 11 }
  0x32   : > { %s3731_s30 = scalar_select %p2716_p7, 1, 0 }
  0x33   : > { %s1947_s7 = sshll.u32 %s208_s29, 7  ;;  %s2726_s10 = scalar_lea.hbm %s3661_s0, %s2024_s6 }
  0x34   : > { %s212_s11 = scalar_lea.vmem [#allocation2], %s1947_s7  ;;  %p2730_p11 = pnand %p2183_p9, %p38_p12 }
  0x35   : > { %s219_s12 = sshll.u32 %s212_s11, 4  ;;  %s2734_s14 = scalar_lea.sflag [#allocation3], %s208_s29  ;;  %s2728_s12 = int_to_ptr.vmem [resolvable:$true] %s219_s12 }
  0x36   : > { %s2490_s15 = scalar_lea.hbm %s2726_s10, 2048  ;;  %p2492_p0 = pneg %p2730_p11 }
  0x37   : > { %p2491_p13 = scmp.ne.s32.totalorder %s2726_s10, %s2490_s15  ;;  %s2495_s27 = scalar_lea.hbm %s3661_s0, 4096 }
  0x38   : > { %p2496_p1 = scmp.lt.s32.totalorder %s2726_s10, %s3661_s0  ;;  %p2497_p2 = scmp.lt.s32.totalorder %s2495_s27, %s2490_s15 }
  0x39   : > { %p2493_p5 = pnand %p2492_p0, %p2491_p13 }
  0x3a   : > { %p2498_p6 = por %p2497_p2, %p2496_p1 }
  0x3b   : > { %p2494_p10 = pneg %p2493_p5 }
  0x3d   : > { %p2499_p12 = pnand %p2498_p6, %p2494_p10 }
  0x3f   : > { %2502 = shalt.err (!%p2499_p12)
}
  0x40   : > { %s2503_s29 = scalar_lea.vmem %s2728_s12, 2048  ;;  %s2594_s8 = smov [#allocation2]  }
  0x41   : > { %p2504_p3 = scmp.ne.s32.totalorder %s2728_s12, %s2503_s29  ;;  %s2508_s9 = sshll.u32 %s2594_s8, 4  ;;  %s2509_s9 = int_to_ptr.vmem [resolvable:$false] %s2508_s9 }
  0x42   : > { %s2510_s11 = scalar_lea.vmem %s2509_s9, 4096  ;;  %p2511_p5 = scmp.lt.s32.totalorder %s2728_s12, %s2509_s9 }
  0x43   : > { %p2506_p9 = pnand %p2504_p3, %p2492_p0  ;;  %p2512_p7 = scmp.lt.s32.totalorder %s2510_s11, %s2503_s29 }
  0x45   : > { %p2507_p13 = pneg %p2506_p9  ;;  %p2513_p4 = por %p2512_p7, %p2511_p5 }
  0x47   : > { %p2514_p8 = pnand %p2513_p4, %p2507_p13 }
  0x49   : > { %2517 = shalt.err (!%p2514_p8)
}
  0x4a   : > { %s2595_s15 = smov 128   ;;  %s2596_s16 = smov 8  }
  0x4b   : > { %2176 = dma.hbm_to_vmem [thread:$0]  (!%p2730_p11), %s2726_s10, 2048, %s2728_s12, %s2734_s14, %s2595_s15, %s2595_s15, %s2596_s16  }
  0x4c   : > { %p3733_p0 = scmp.ne.s32.totalorder %s3728_s26, 0 }
  0x4e   : > { %231 = sbr.rel (%p3733_p0) target bundleno = 714 (0x2ca), region = 40 }
  0x53   : > { %s2758_s23 = sand.u32 1, %s2578_s19   ;;  %p3734_p4 = scmp.ne.s32.totalorder %s3726_s24, 0 }
  0x54   : > { %s1951_s27 = sshll.u32 %s2758_s23, 7  ;;  %s234_s7 = scalar_lea.sflag [#allocation3], %s2758_s23 }
  0x55   : > { %s2764_s6 = scalar_lea.vmem [#allocation2], %s1951_s27 }
  0x56   : > { %2561 = dma.done.wait (%p3734_p4), %s234_s7, 2048  }
  0x57   : > { %2563 = vsyncadd (%p3734_p4), %s234_s7, 4294965248  ;;  %p3735_p8 = scmp.eq.s32.totalorder %s2652_s22, 0 }
  0x59   : > { %2565 = dma.done.wait (%p3735_p8), [#allocation6], 8192   ;;  %p3736_p7 = pmov %p3735_p8 }
  0x5a   : > { %v2597_v0 = vmov 0   ;;  %v2230_v1 = vld [vmem:[#allocation5 + $0xe4] ss:$16 sps:$4 sm:$0xff]   ;;  %v2232_v2 = vld [vmem:[#allocation5 + $0xec] ss:$16 sps:$4 sm:$0xff]   ;;  %s3579_s13 = scalar_lea.vmem [#allocation8], %s1951_s27 }
  0x5b   : > { %2567 = vsyncadd (%p3736_p7), [#allocation6], 4294959104  ;;  %562 = vmatprep.mubr.bf16.mxu0 %v2597_v0  ;;  %675 = vmatprep.mubr.bf16.mxu1 %v2597_v0  ;;  %v2234_v3 = vld [vmem:[#allocation5 + $0xe0] ss:$16 sps:$4 sm:$0xff]   ;;  %v2235_v4 = vld [vmem:[#allocation5 + $0xe8] ss:$16 sps:$4 sm:$0xff]  }
  0x5c   : > { %530 = vmatprep.subr.bf16.mxu0 %v2230_v1  ;;  %643 = vmatprep.subr.bf16.mxu1 %v2232_v2  ;;  %v2236_v5 = vld [vmem:[#allocation5 + $0xc4] ss:$16 sps:$4 sm:$0xff]   ;;  %v2238_v6 = vld [vmem:[#allocation5 + $0xcc] ss:$16 sps:$4 sm:$0xff]   ;;  %v2240_v7 = vld [vmem:[#allocation5 + $0xc0] ss:$16 sps:$4 sm:$0xff]  }
  0x5d   : > { %531 = vmatpush1.bf16.msra.mxu0 %v2234_v3  ;;  %644 = vmatpush1.bf16.msra.mxu1 %v2235_v4  ;;  %v2241_v8 = vld [vmem:[#allocation5 + $0xc8] ss:$16 sps:$4 sm:$0xff]   ;;  %v2242_v9 = vld [vmem:[#allocation5 + $0xa4] ss:$16 sps:$4 sm:$0xff]   ;;  %v2244_v10 = vld [vmem:[#allocation5 + $0xac] ss:$16 sps:$4 sm:$0xff]  }
  0x5e   : > { %532 = vmatprep.subr.bf16.mxu0 %v2236_v5  ;;  %645 = vmatprep.subr.bf16.mxu1 %v2238_v6  ;;  %v2246_v11 = vld [vmem:[#allocation5 + $0xa0] ss:$16 sps:$4 sm:$0xff]   ;;  %v2247_v12 = vld [vmem:[#allocation5 + $0xa8] ss:$16 sps:$4 sm:$0xff]   ;;  %v2248_v13 = vld [vmem:[#allocation5 + $0x84] ss:$16 sps:$4 sm:$0xff]  }
  0x5f   : > { %v2250_v14 = vld [vmem:[#allocation5 + $0x8c] ss:$16 sps:$4 sm:$0xff]   ;;  %v2252_v15 = vld [vmem:[#allocation5 + $0x80] ss:$16 sps:$4 sm:$0xff]   ;;  %v2253_v16 = vld [vmem:[#allocation5 + $0x88] ss:$16 sps:$4 sm:$0xff]  }
  0x60   : > { %v2254_v17 = vld [vmem:[#allocation5 + $0x64] ss:$16 sps:$4 sm:$0xff]   ;;  %v2256_v18 = vld [vmem:[#allocation5 + $0x6c] ss:$16 sps:$4 sm:$0xff]   ;;  %v2258_v19 = vld [vmem:[#allocation5 + $0x60] ss:$16 sps:$4 sm:$0xff]  }
  0x61   : > { %533 = vmatpush1.bf16.msra.mxu0 %v2240_v7  ;;  %646 = vmatpush1.bf16.msra.mxu1 %v2241_v8  ;;  %v2259_v20 = vld [vmem:[#allocation5 + $0x68] ss:$16 sps:$4 sm:$0xff]   ;;  %v2260_v21 = vld [vmem:[#allocation5 + $0x44] ss:$16 sps:$4 sm:$0xff]   ;;  %v2262_v22 = vld [vmem:[#allocation5 + $0x4c] ss:$16 sps:$4 sm:$0xff]  }
  0x62   : > { %534 = vmatprep.subr.bf16.mxu0 %v2242_v9  ;;  %647 = vmatprep.subr.bf16.mxu1 %v2244_v10  ;;  %v2264_v23 = vld [vmem:[#allocation5 + $0x40] ss:$16 sps:$4 sm:$0xff]   ;;  %v2265_v24 = vld [vmem:[#allocation5 + $0x48] ss:$16 sps:$4 sm:$0xff]   ;;  %v2266_v25 = vld [vmem:[#allocation5 + $0x24] ss:$16 sps:$4 sm:$0xff]  }
  0x63   : > { %v2268_v26 = vld [vmem:[#allocation5 + $0x2c] ss:$16 sps:$4 sm:$0xff]   ;;  %v2270_v27 = vld [vmem:[#allocation5 + $0x20] ss:$16 sps:$4 sm:$0xff]   ;;  %v2271_v28 = vld [vmem:[#allocation5 + $0x28] ss:$16 sps:$4 sm:$0xff]  }
  0x64   : > { %v2272_v29 = vld [vmem:[#allocation5 + $0x4] ss:$16 sps:$4 sm:$0xff]   ;;  %v2274_v30 = vld [vmem:[#allocation5 + $0xc] ss:$16 sps:$4 sm:$0xff]   ;;  %v2276_v31 = vld [vmem:[#allocation5] ss:$16 sps:$4 sm:$0xff]  }
  0x65   : > { %535 = vmatpush1.bf16.msra.mxu0 %v2246_v11  ;;  %648 = vmatpush1.bf16.msra.mxu1 %v2247_v12  ;;  %v2277_v32 = vld [vmem:[#allocation5 + $0x8] ss:$16 sps:$4 sm:$0xff]   ;;  %v275_v33 = vld [vmem:[%s2764_s6] sm:$0xff]  ;;  %v2282_v40 = vld [vmem:[#allocation7 + $0x70] sm:$0xff]   ;;  %s2025_s14 = sshll.u32 %s2652_s22, 11  ;;  %s1850_s29 = sshll.u32 %s3579_s13, 4  ;;  %s3617_s29 = int_to_ptr.vmem [resolvable:$true] %s1850_s29 }
  0x66   : > { %536 = vmatprep.subr.bf16.mxu0 %v2248_v13  ;;  %649 = vmatprep.subr.bf16.mxu1 %v2250_v14  ;;  %v276_v34 = vld [vmem:[%s2764_s6 + $0x8] sm:$0xff]  ;;  %v2278_v35 = vld [vmem:[#allocation7 + $0x78] sm:$0xff]   ;;  %v277_v41 = vld [vmem:[%s2764_s6 + $0x10] sm:$0xff]  ;;  %s3615_s11 = scalar_lea.hbm %s3666_s5, %s2025_s14  ;;  %s1837_s15 = scalar_lea.sflag [#allocation4], %s2758_s23 }
  0x67   : > { %v2280_v36 = vld [vmem:[#allocation7 + $0xf8] sm:$0xff]   ;;  %v291_v37 = vpack.c.bf16 %v276_v34, %v275_v33  ;;  %v2284_v43 = vld [vmem:[#allocation7 + $0xf0] sm:$0xff]   ;;  %v2286_v46 = vld [vmem:[#allocation7 + $0x68] sm:$0xff]   ;;  %s2518_s22 = scalar_lea.vmem %s3617_s29, 2048  ;;  %p3868_p10 = scmp.ne.s32.totalorder %s3731_s30, 0 }
  0x68   : > { %v2279_v38 = vld [vmem:[#allocation7 + $0x38] sm:$0xff]   ;;  %v2283_v44 = vld [vmem:[#allocation7 + $0x30] sm:$0xff]   ;;  %v2288_v47 = vld [vmem:[#allocation7 + $0xe8] sm:$0xff]   ;;  %p2519_p11 = scmp.ne.s32.totalorder %s3617_s29, %s2518_s22  ;;  %s2598_s16 = smov [#allocation8]  }
  0x69   : > { %537 = vmatpush1.bf16.msra.mxu0 %v2252_v15  ;;  %650 = vmatpush1.bf16.msra.mxu1 %v2253_v16  ;;  %v2281_v39 = vld [vmem:[#allocation7 + $0xb8] sm:$0xff]   ;;  %v2285_v45 = vld [vmem:[#allocation7 + $0xb0] sm:$0xff]   ;;  %v2287_v49 = vld [vmem:[#allocation7 + $0x28] sm:$0xff]   ;;  %s2522_s27 = sshll.u32 %s2598_s16, 4  ;;  %s2523_s27 = int_to_ptr.vmem [resolvable:$false] %s2522_s27 }
  0x6a   : > { %538 = vmatprep.subr.bf16.mxu0 %v2254_v17  ;;  %651 = vmatprep.subr.bf16.mxu1 %v2256_v18  ;;  %v278_v42 = vld [vmem:[%s2764_s6 + $0x18] sm:$0xff]  ;;  %v2289_v50 = vld [vmem:[#allocation7 + $0xa8] sm:$0xff]   ;;  %v2290_v51 = vld [vmem:[#allocation7 + $0x60] sm:$0xff]   ;;  %p2520_p1 = pnand %p2519_p11, %p3868_p10  ;;  %s2524_s7 = scalar_lea.vmem %s2523_s27, 4096 }
  0x6b   : > { %v292_v48 = vpack.c.bf16 %v278_v42, %v277_v41  ;;  %v279_v52 = vld [vmem:[%s2764_s6 + $0x20] sm:$0xff]  ;;  %v280_v53 = vld [vmem:[%s2764_s6 + $0x28] sm:$0xff]  ;;  %v281_v55 = vld [vmem:[%s2764_s6 + $0x30] sm:$0xff]  ;;  %p2525_p6 = scmp.lt.s32.totalorder %s3617_s29, %s2523_s27  ;;  %p2526_p12 = scmp.lt.s32.totalorder %s2524_s7, %s2518_s22 }
  0x6c   : > { %v293_v54 = vpack.c.bf16 %v280_v53, %v279_v52  ;;  %v282_v56 = vld [vmem:[%s2764_s6 + $0x38] sm:$0xff]  ;;  %v283_v58 = vld [vmem:[%s2764_s6 + $0x40] sm:$0xff]  ;;  %v284_v59 = vld [vmem:[%s2764_s6 + $0x48] sm:$0xff]  ;;  %p2521_p2 = pneg %p2520_p1 }
  0x6d   : > { %539 = vmatpush1.bf16.msra.mxu0 %v2258_v19  ;;  %652 = vmatpush1.bf16.msra.mxu1 %v2259_v20  ;;  %v294_v57 = vpack.c.bf16 %v282_v56, %v281_v55  ;;  %v295_v60 = vpack.c.bf16 %v284_v59, %v283_v58  ;;  %v285_v61 = vld [vmem:[%s2764_s6 + $0x50] sm:$0xff]  ;;  %v286_v62 = vld [vmem:[%s2764_s6 + $0x58] sm:$0xff]  ;;  %v287_v1 = vld [vmem:[%s2764_s6 + $0x60] sm:$0xff]  ;;  %p2527_p3 = por %p2526_p12, %p2525_p6 }
  0x6e   : > { %540 = vmatprep.subr.bf16.mxu0 %v2260_v21  ;;  %653 = vmatprep.subr.bf16.mxu1 %v2262_v22  ;;  %v296_v63 = vpack.c.bf16 %v286_v62, %v285_v61  ;;  %v288_v2 = vld [vmem:[%s2764_s6 + $0x68] sm:$0xff]  ;;  %v289_v4 = vld [vmem:[%s2764_s6 + $0x70] sm:$0xff]  ;;  %v290_v5 = vld [vmem:[%s2764_s6 + $0x78] sm:$0xff] }
  0x6f   : > { %v297_v3 = vpack.c.bf16 %v288_v2, %v287_v1  ;;  %v298_v6 = vpack.c.bf16 %v290_v5, %v289_v4  ;;  %v2291_v7 = vld [vmem:[#allocation7 + $0x20] sm:$0xff]   ;;  %v2294_v10 = vld [vmem:[#allocation7 + $0x58] sm:$0xff]   ;;  %v2299_v14 = vld [vmem:[#allocation7 + $0x10] sm:$0xff]   ;;  %p2528_p9 = pnand %p2527_p3, %p2521_p2 }
  0x70   : > { %v2292_v8 = vld [vmem:[#allocation7 + $0xe0] sm:$0xff]   ;;  %v2295_v11 = vld [vmem:[#allocation7 + $0x18] sm:$0xff]   ;;  %v2300_v15 = vld [vmem:[#allocation7 + $0xd0] sm:$0xff]  }
  0x71   : > { %541 = vmatpush1.bf16.msra.mxu0 %v2264_v23  ;;  %654 = vmatpush1.bf16.msra.mxu1 %v2265_v24  ;;  %v2293_v9 = vld [vmem:[#allocation7 + $0xa0] sm:$0xff]   ;;  %v2296_v12 = vld [vmem:[#allocation7 + $0xd8] sm:$0xff]   ;;  %v2301_v16 = vld [vmem:[#allocation7 + $0x90] sm:$0xff]  }
  0x72   : > { %542 = vmatprep.subr.bf16.mxu0 %v2266_v25  ;;  %655 = vmatprep.subr.bf16.mxu1 %v2268_v26  ;;  %v2297_v13 = vld [vmem:[#allocation7 + $0x98] sm:$0xff]   ;;  %v2302_v17 = vld [vmem:[#allocation7 + $0x48] sm:$0xff]   ;;  %v2306_v21 = vld [vmem:[#allocation7 + $0x40] sm:$0xff]   ;;  %v334_v25 = vlaneseq }
  0x73   : > { %v2303_v18 = vld [vmem:[#allocation7 + $0x8] sm:$0xff]   ;;  %v2308_v22 = vld [vmem:[#allocation7 + $0xc0] sm:$0xff]  }
  0x74   : > { %v2304_v19 = vld [vmem:[#allocation7 + $0xc8] sm:$0xff]   ;;  %v2307_v23 = vld [vmem:[#allocation7] sm:$0xff]   ;;  %v335_v26 = vshrl.u32 %v334_v25, 7 }
  0x75   : > { %543 = vmatpush1.bf16.msra.mxu0 %v2270_v27  ;;  %656 = vmatpush1.bf16.msra.mxu1 %v2271_v28  ;;  %v2305_v20 = vld [vmem:[#allocation7 + $0x88] sm:$0xff]   ;;  %v2309_v24 = vld [vmem:[#allocation7 + $0x80] sm:$0xff]  }
  0x76   : > { %544 = vmatprep.subr.bf16.mxu0 %v2272_v29  ;;  %657 = vmatprep.subr.bf16.mxu1 %v2274_v30  ;;  %v331_v27 = vld [vmem:[%s3663_s2] sm:$0xf]  ;;  %v2809_v29 = vsub.s32 0, %v335_v26  ;;  %v344_v30 = vsub.s32 4, %v335_v26 }
  0x77   : > { %v332_v28 = vunpack.c.l.bf16 %v331_v27 }
  0x78   : > { %3737 = vst [vmem:[#allocation12_spill] sm:$0xff] %v2809_v29 }
  0x79   : > { %545 = vmatpush1.bf16.msra.mxu0 %v2276_v31  ;;  %658 = vmatpush1.bf16.msra.mxu1 %v2277_v32  ;;  %v340_v31 = vsub.s32 2, %v335_v26  ;;  %v348_v32 = vsub.s32 6, %v335_v26  ;;  %v337_v33 = vrot.slane %v332_v28, %v2809_v29  ;;  %v345_v34 = vrot.slane %v332_v28, %v344_v30 }
  0x7a   : > { %2026 = vmatprep.subr.bf16.mxu0 %v2278_v35  ;;  %2090 = vmatprep.subr.bf16.mxu1 %v2280_v36 }
  0x7b   : > { %v341_v35 = vrot.slane %v332_v28, %v340_v31  ;;  %v349_v36 = vrot.slane %v332_v28, %v348_v32 }
  0x7c   : > { %563 = vmatmul.mubr.bf16.vlgmr.msra.gmra.mxu0 %v291_v37  ;;  %676 = vmatmul.mubr.bf16.vlgmr.msra.gmra.mxu1 %v291_v37  ;;  %v2813_v37 = vrot.slane %v337_v33, %v2809_v29 }
  0x7d   : > { %572 = vmatprep.mubr.bf16.mxu0 %v2597_v0  ;;  %685 = vmatprep.mubr.bf16.mxu1 %v2597_v0  ;;  %v2819_v41 = vrot.slane %v341_v35, %v2809_v29  ;;  %v2822_v42 = vrot.slane %v349_v36, %v2809_v29 }
  0x7e   : > { %2027 = vmatpush3.bf16.msra.mxu0 %v2279_v38  ;;  %2091 = vmatpush3.bf16.msra.mxu1 %v2281_v39  ;;  %v2816_v38 = vrot.slane %v345_v34, %v2809_v29 }
  0x7f   : > { %2028 = vmatprep.subr.bf16.mxu0 %v2282_v40  ;;  %2092 = vmatprep.subr.bf16.mxu1 %v2284_v43 }
  0x82   : > { %2029 = vmatpush3.bf16.msra.mxu0 %v2283_v44  ;;  %2093 = vmatpush3.bf16.msra.mxu1 %v2285_v45 }
  0x83   : > { %2030 = vmatprep.subr.bf16.mxu0 %v2286_v46  ;;  %2094 = vmatprep.subr.bf16.mxu1 %v2288_v47 }
  0x84   : > { %573 = vmatmul.mubr.bf16.gmra.mxu0 %v292_v48  ;;  %686 = vmatmul.mubr.bf16.gmra.mxu1 %v292_v48 }
  0x85   : > { %582 = vmatprep.mubr.bf16.mxu0 %v2597_v0  ;;  %695 = vmatprep.mubr.bf16.mxu1 %v2597_v0 }
  0x86   : > { %2031 = vmatpush3.bf16.msra.mxu0 %v2287_v49  ;;  %2095 = vmatpush3.bf16.msra.mxu1 %v2289_v50 }
  0x87   : > { %2032 = vmatprep.subr.bf16.mxu0 %v2290_v51  ;;  %2096 = vmatprep.subr.bf16.mxu1 %v2292_v8 }
  0x8a   : > { %2033 = vmatpush3.bf16.msra.mxu0 %v2291_v7  ;;  %2097 = vmatpush3.bf16.msra.mxu1 %v2293_v9 }
  0x8b   : > { %2034 = vmatprep.subr.bf16.mxu0 %v2294_v10  ;;  %2098 = vmatprep.subr.bf16.mxu1 %v2296_v12 }
  0x8c   : > { %583 = vmatmul.mubr.bf16.gmra.mxu0 %v293_v54  ;;  %696 = vmatmul.mubr.bf16.gmra.mxu1 %v293_v54 }
  0x8d   : > { %592 = vmatprep.mubr.bf16.mxu0 %v2597_v0  ;;  %705 = vmatprep.mubr.bf16.mxu1 %v2597_v0 }
  0x8e   : > { %2035 = vmatpush3.bf16.msra.mxu0 %v2295_v11  ;;  %2099 = vmatpush3.bf16.msra.mxu1 %v2297_v13 }
  0x8f   : > { %2100 = vmatprep.subr.bf16.mxu1 %v2300_v15 }
  0x92   : > { %2101 = vmatpush3.bf16.msra.mxu1 %v2301_v16 }
  0x93   : > { %2102 = vmatprep.subr.bf16.mxu1 %v2304_v19 }
  0x94   : > { %593 = vmatmul.mubr.bf16.gmra.mxu0 %v294_v57  ;;  %706 = vmatmul.mubr.bf16.gmra.mxu1 %v294_v57 }
  0x95   : > { %602 = vmatprep.mubr.bf16.mxu0 %v2597_v0  ;;  %715 = vmatprep.mubr.bf16.mxu1 %v2597_v0 }
  0x96   : > { %2103 = vmatpush3.bf16.msra.mxu1 %v2305_v20 }
  0x97   : > { %2104 = vmatprep.subr.bf16.mxu1 %v2308_v22 }
  0x9a   : > { %2105 = vmatpush3.bf16.msra.mxu1 %v2309_v24 }
  0x9c   : > { %603 = vmatmul.mubr.bf16.gmra.mxu0 %v295_v60  ;;  %716 = vmatmul.mubr.bf16.gmra.mxu1 %v295_v60 }
  0x9d   : > { %612 = vmatprep.mubr.bf16.mxu0 %v2597_v0  ;;  %725 = vmatprep.mubr.bf16.mxu1 %v2597_v0 }
  0xa4   : > { %613 = vmatmul.mubr.bf16.gmra.mxu0 %v296_v63  ;;  %726 = vmatmul.mubr.bf16.gmra.mxu1 %v296_v63 }
  0xa5   : > { %622 = vmatprep.mubr.bf16.mxu0 %v2597_v0  ;;  %735 = vmatprep.mubr.bf16.mxu1 %v2597_v0 }
  0xac   : > { %623 = vmatmul.mubr.bf16.gmra.mxu0 %v297_v3  ;;  %736 = vmatmul.mubr.bf16.gmra.mxu1 %v297_v3 }
  0xad   : > { %632 = vmatprep.mubr.bf16.mxu0 %v2597_v0  ;;  %745 = vmatprep.mubr.bf16.mxu1 %v2597_v0  ;;  %v2298_v0 = vld [vmem:[#allocation7 + $0x50] sm:$0xff]  }
  0xae   : > { %2036 = vmatprep.subr.bf16.mxu0 %v2298_v0 }
  0xaf   : > { %2037 = vmatpush3.bf16.msra.mxu0 %v2299_v14 }
  0xb0   : > { %2038 = vmatprep.subr.bf16.mxu0 %v2302_v17 }
  0xb3   : > { %2039 = vmatpush3.bf16.msra.mxu0 %v2303_v18 }
  0xb4   : > { %633 = vmatmul.mubr.bf16.gmra.mxu0 %v298_v6  ;;  %746 = vmatmul.mubr.bf16.gmra.mxu1 %v298_v6 }
  0xb5   : > { %2040 = vmatprep.subr.bf16.mxu0 %v2306_v21 }
  0xb7   : > { %2041 = vmatpush3.bf16.msra.mxu0 %v2307_v23 }
 0x13c   : > { %v564_v39 = vpop.f32.mrf.mxu0  ;;  %v677_v40 = vpop.f32.mrf.mxu1 }
 0x13d   : > { %v565_v43 = vadd.f32 %v564_v39, %v2813_v37  ;;  %v678_v44 = vadd.f32 %v677_v40, %v2816_v38 }
 0x13e   : > { %v566_v45 = vpop.f32.mrf.mxu0  ;;  %v679_v46 = vpop.f32.mrf.mxu1 }
 0x13f   : > { %v820_v47 = vmul.f32 0.044715, %v565_v43  ;;  %v822_v48 = vmul.f32 0.044715, %v678_v44  ;;  %v2827_v49 = vadd.f32 %v566_v45, %v2819_v41  ;;  %v2830_v50 = vadd.f32 %v679_v46, %v2822_v42 }
 0x140   : > { %v568_v51 = vpop.f32.mrf.mxu0  ;;  %v681_v52 = vpop.f32.mrf.mxu1  ;;  %v2842_v11 = vmul.f32 0.5, %v565_v43  ;;  %v2844_v0 = vmul.f32 0.5, %v678_v44 }
 0x141   : > { %v884_v53 = vmul.f32 %v820_v47, %v565_v43  ;;  %v886_v54 = vmul.f32 %v822_v48, %v678_v44  ;;  %v569_v55 = vadd.f32 %v568_v51, %v2813_v37  ;;  %v682_v56 = vadd.f32 %v681_v52, %v2816_v38 }
 0x142   : > { %v570_v57 = vpop.f32.mrf.mxu0  ;;  %v683_v58 = vpop.f32.mrf.mxu1  ;;  %v821_v62 = vmul.f32 0.044715, %v2827_v49  ;;  %v823_v4 = vmul.f32 0.044715, %v2830_v50  ;;  %v2853_v22 = vmul.f32 0.5, %v2827_v49  ;;  %v2863_v28 = vmul.f32 0.5, %v2830_v50 }
 0x143   : > { %v948_v59 = vmul.f32 %v884_v53, %v565_v43  ;;  %v950_v60 = vmul.f32 %v886_v54, %v678_v44  ;;  %v824_v61 = vmul.f32 0.044715, %v569_v55  ;;  %v826_v63 = vmul.f32 0.044715, %v682_v56 }
 0x144   : > { %v574_v1 = vpop.f32.mrf.mxu0  ;;  %v687_v2 = vpop.f32.mrf.mxu1  ;;  %v2837_v6 = vadd.f32 %v570_v57, %v2819_v41  ;;  %v2840_v8 = vadd.f32 %v683_v58, %v2822_v42  ;;  %v885_v14 = vmul.f32 %v821_v62, %v2827_v49  ;;  %v887_v20 = vmul.f32 %v823_v4, %v2830_v50  ;;  %3739 = vst [vmem:[#allocation14_spill] sm:$0xff] %v2853_v22 }
 0x145   : > { %v1012_v3 = vadd.f32 %v948_v59, %v565_v43  ;;  %v888_v5 = vmul.f32 %v824_v61, %v569_v55  ;;  %v890_v7 = vmul.f32 %v826_v63, %v682_v56  ;;  %v1014_v12 = vadd.f32 %v950_v60, %v678_v44  ;;  %3741 = vst [vmem:[#allocation16_spill] sm:$0xff] %v2863_v28 }
 0x146   : > { %v576_v9 = vpop.f32.mrf.mxu0  ;;  %v689_v10 = vpop.f32.mrf.mxu1  ;;  %v825_v16 = vmul.f32 0.044715, %v2837_v6  ;;  %v2850_v21 = vadd.f32 %v574_v1, %v2813_v37  ;;  %v827_v23 = vmul.f32 0.044715, %v2840_v8  ;;  %v2857_v24 = vadd.f32 %v687_v2, %v2816_v38 }
 0x147   : > { %v952_v13 = vmul.f32 %v888_v5, %v569_v55  ;;  %v954_v15 = vmul.f32 %v890_v7, %v682_v56  ;;  %v1076_v19 = vmul.f32 0.7978846, %v1012_v3  ;;  %v2860_v25 = vadd.f32 %v576_v9, %v2819_v41 }
 0x148   : > { %v578_v17 = vpop.f32.mrf.mxu0  ;;  %v691_v18 = vpop.f32.mrf.mxu1  ;;  %3738 = vst [vmem:[#allocation13_spill] sm:$0xff] %v2850_v21  ;;  %3740 = vst [vmem:[#allocation15_spill] sm:$0xff] %v2857_v24  ;;  %v1078_v30 = vmul.f32 0.7978846, %v1014_v12  ;;  %v2865_v31 = vmul.f32 0.5, %v569_v55  ;;  %v2867_v33 = vmul.f32 0.5, %v682_v56  ;;  %v2870_v34 = vmul.f32 %v885_v14, %v2827_v49 }
 0x149   : > { %v1016_v32 = vadd.f32 %v952_v13, %v569_v55  ;;  %v1018_v35 = vadd.f32 %v954_v15, %v682_v56  ;;  %v889_v36 = vmul.f32 %v825_v16, %v2837_v6  ;;  %v2874_v39 = vadd.f32 %v689_v10, %v2822_v42 }
 0x14a   : > { %v580_v26 = vpop.f32.mrf.mxu0  ;;  %v693_v27 = vpop.f32.mrf.mxu1  ;;  %2310 = vtanh.f32 %v1076_v19  ;;  %v2877_v44 = vmul.f32 %v887_v20, %v2830_v50  ;;  %v828_v45 = vmul.f32 0.044715, %v2850_v21  ;;  %v2881_v46 = vadd.f32 %v578_v17, %v2813_v37 }
 0x14b   : > { %3742 = vst [vmem:[#allocation17_spill] sm:$0xff] %v2874_v39  ;;  %v891_v47 = vmul.f32 %v827_v23, %v2840_v8  ;;  %v830_v48 = vmul.f32 0.044715, %v2857_v24  ;;  %v829_v51 = vmul.f32 0.044715, %v2860_v25  ;;  %v2887_v52 = vadd.f32 %v691_v18, %v2816_v38 }
 0x14c   : > { %v584_v40 = vpop.f32.mrf.mxu0  ;;  %v697_v43 = vpop.f32.mrf.mxu1  ;;  %3743 = vst [vmem:[#allocation18_spill] sm:$0xff] %v2881_v46  ;;  %2312 = vtanh.f32 %v1078_v30  ;;  %v1080_v55 = vmul.f32 0.7978846, %v1016_v32  ;;  %v831_v56 = vmul.f32 0.044715, %v2874_v39  ;;  %v2891_v57 = vadd.f32 %v580_v26, %v2819_v41 }
 0x14d   : > { %3744 = vst [vmem:[#allocation19_spill] sm:$0xff] %v2887_v52  ;;  %v1082_v58 = vmul.f32 0.7978846, %v1018_v35  ;;  %v2894_v59 = vmul.f32 %v889_v36, %v2837_v6  ;;  %v2897_v60 = vadd.f32 %v693_v27, %v2822_v42  ;;  %v2900_v61 = vadd.f32 %v584_v40, %v2813_v37 }
 0x14e   : > { %v586_v53 = vpop.f32.mrf.mxu0  ;;  %v699_v54 = vpop.f32.mrf.mxu1  ;;  %v892_v1 = vmul.f32 %v828_v45, %v2850_v21  ;;  %v832_v2 = vmul.f32 0.044715, %v2881_v46  ;;  %v2905_v3 = vadd.f32 %v697_v43, %v2816_v38  ;;  %v2911_v5 = vmul.f32 %v891_v47, %v2840_v8 }
 0x14f   : > { %3745 = vst [vmem:[#allocation20_spill] sm:$0xff] %v2897_v60  ;;  %3746 = vst [vmem:[#allocation21_spill] sm:$0xff] %v2900_v61  ;;  %v2908_v4 = vadd.f32 %v586_v53, %v2819_v41  ;;  %v894_v7 = vmul.f32 %v830_v48, %v2857_v24  ;;  %v893_v9 = vmul.f32 %v829_v51, %v2860_v25  ;;  %v834_v10 = vmul.f32 0.044715, %v2887_v52 }
 0x150   : > { %v588_v62 = vpop.f32.mrf.mxu0  ;;  %v701_v63 = vpop.f32.mrf.mxu1  ;;  %3747 = vst [vmem:[#allocation22_spill] sm:$0xff] %v2905_v3  ;;  %2314 = vtanh.f32 %v1080_v55  ;;  %v895_v14 = vmul.f32 %v831_v56, %v2874_v39  ;;  %v833_v15 = vmul.f32 0.044715, %v2891_v57  ;;  %v835_v16 = vmul.f32 0.044715, %v2897_v60 }
 0x151   : > { %3748 = vst [vmem:[#allocation23_spill] sm:$0xff] %v2908_v4  ;;  %2316 = vtanh.f32 %v1082_v58  ;;  %v836_v17 = vmul.f32 0.044715, %v2900_v61  ;;  %v838_v18 = vmul.f32 0.044715, %v2905_v3  ;;  %v2923_v26 = vmul.f32 %v892_v1, %v2850_v21 }
 0x152   : > { %v590_v12 = vpop.f32.mrf.mxu0  ;;  %v703_v13 = vpop.f32.mrf.mxu1  ;;  %v837_v19 = vmul.f32 0.044715, %v2908_v4  ;;  %v896_v27 = vmul.f32 %v832_v2, %v2881_v46  ;;  %v2927_v30 = vadd.f32 %v699_v54, %v2822_v42  ;;  %v2930_v32 = vadd.f32 %v588_v62, %v2813_v37 }
 0x153   : > { %3749 = vst [vmem:[#allocation24_spill] sm:$0xff] %v2923_v26  ;;  %v2933_v35 = vmul.f32 %v894_v7, %v2857_v24  ;;  %v2936_v36 = vmul.f32 %v893_v9, %v2860_v25  ;;  %v898_v40 = vmul.f32 %v834_v10, %v2887_v52  ;;  %v2940_v43 = vadd.f32 %v701_v63, %v2816_v38 }
 0x154   : > { %v594_v20 = vpop.f32.mrf.mxu0  ;;  %v707_v23 = vpop.f32.mrf.mxu1  ;;  %3750 = vst [vmem:[#allocation25_spill] sm:$0xff] %v2927_v30  ;;  %v2943_v48 = vmul.f32 %v895_v14, %v2874_v39  ;;  %v897_v51 = vmul.f32 %v833_v15, %v2891_v57  ;;  %v899_v53 = vmul.f32 %v835_v16, %v2897_v60  ;;  %v2948_v54 = vadd.f32 %v590_v12, %v2819_v41 }
 0x155   : > { %3751 = vst [vmem:[#allocation26_spill] sm:$0xff] %v2933_v35  ;;  %v900_v55 = vmul.f32 %v836_v17, %v2900_v61  ;;  %v902_v56 = vmul.f32 %v838_v18, %v2905_v3  ;;  %v901_v58 = vmul.f32 %v837_v19, %v2908_v4  ;;  %v2954_v62 = vadd.f32 %v703_v13, %v2822_v42 }
 0x156   : > { %v596_v45 = vpop.f32.mrf.mxu0  ;;  %v709_v47 = vpop.f32.mrf.mxu1  ;;  %3752 = vst [vmem:[#allocation27_spill] sm:$0xff] %v2943_v48  ;;  %v2957_v2 = vmul.f32 %v896_v27, %v2881_v46  ;;  %v839_v7 = vmul.f32 0.044715, %v2927_v30  ;;  %v840_v9 = vmul.f32 0.044715, %v2930_v32  ;;  %v2962_v10 = vadd.f32 %v594_v20, %v2813_v37 }
 0x157   : > { %v2964_v12 = vpop.eup %2310  ;;  %v2967_v14 = vmul.f32 %v898_v40, %v2887_v52  ;;  %v842_v13 = vmul.f32 0.044715, %v2940_v43  ;;  %v841_v15 = vmul.f32 0.044715, %v2948_v54  ;;  %v2972_v16 = vadd.f32 %v707_v23, %v2816_v38 }
 0x158   : > { %v598_v63 = vpop.f32.mrf.mxu0  ;;  %v711_v1 = vpop.f32.mrf.mxu1  ;;  %3753 = vst [vmem:[#allocation28_spill] sm:$0xff] %v2957_v2  ;;  %v2975_v19 = vmul.f32 %v897_v51, %v2891_v57  ;;  %v2978_v20 = vmul.f32 %v899_v53, %v2897_v60  ;;  %v843_v27 = vmul.f32 0.044715, %v2954_v62  ;;  %v2982_v40 = vadd.f32 %v596_v45, %v2819_v41 }
 0x159   : > { %3754 = vst [vmem:[#allocation29_spill] sm:$0xff] %v2967_v14  ;;  %v2984_v29 = vpop.eup %2312  ;;  %v2987_v14 = vmul.f32 %v900_v55, %v2900_v61  ;;  %v2990_v23 = vmul.f32 %v902_v56, %v2905_v3  ;;  %v2993_v52 = vmul.f32 %v901_v58, %v2908_v4  ;;  %v2996_v51 = vadd.f32 %v709_v47, %v2822_v42 }
 0x15a   : > { %v600_v17 = vpop.f32.mrf.mxu0  ;;  %v713_v18 = vpop.f32.mrf.mxu1  ;;  %3755 = vst [vmem:[#allocation30_spill] sm:$0xff] %v2975_v19  ;;  %3756 = vst [vmem:[#allocation31_spill] sm:$0xff] %v2978_v20  ;;  %v903_v24 = vmul.f32 %v839_v7, %v2927_v30  ;;  %v904_v45 = vmul.f32 %v840_v9, %v2930_v32  ;;  %v844_v2 = vmul.f32 0.044715, %v2962_v10  ;;  %v3002_v55 = vadd.f32 %v598_v63, %v2813_v37 }
 0x15b   : > { %3757 = vst [vmem:[#allocation32_spill] sm:$0xff] %v2987_v14  ;;  %3758 = vst [vmem:[#allocation33_spill] sm:$0xff] %v2990_v23  ;;  %v906_v56 = vmul.f32 %v842_v13, %v2940_v43  ;;  %v905_v23 = vmul.f32 %v841_v15, %v2948_v54  ;;  %v846_v58 = vmul.f32 0.044715, %v2972_v16  ;;  %v3008_v47 = vadd.f32 %v711_v1, %v2816_v38 }
 0x15c   : > { %3759 = vst [vmem:[#allocation34_spill] sm:$0xff] %v2993_v52  ;;  %v604_v53 = vpop.f32.mrf.mxu0  ;;  %v717_v35 = vpop.f32.mrf.mxu1  ;;  %v907_v7 = vmul.f32 %v843_v27, %v2954_v62  ;;  %v845_v9 = vmul.f32 0.044715, %v2982_v40  ;;  %v847_v61 = vmul.f32 0.044715, %v2996_v51  ;;  %v3014_v63 = vadd.f32 %v600_v17, %v2819_v41 }
 0x15d   : > { %3760 = vst [vmem:[#allocation35_spill] sm:$0xff] %v3008_v47  ;;  %v3016_v52 = vpop.eup %2314  ;;  %v848_v13 = vmul.f32 0.044715, %v3002_v55  ;;  %v850_v15 = vmul.f32 0.044715, %v3008_v47  ;;  %v3021_v1 = vadd.f32 %v713_v18, %v2822_v42  ;;  %v3024_v4 = vadd.f32 %v604_v53, %v2813_v37 }
 0x15e   : > { %v606_v3 = vpop.f32.mrf.mxu0  ;;  %v719_v14 = vpop.f32.mrf.mxu1  ;;  %v908_v26 = vmul.f32 %v844_v2, %v2962_v10  ;;  %v849_v17 = vmul.f32 0.044715, %v3014_v63  ;;  %v3031_v21 = vadd.f32 %v717_v35, %v2816_v38  ;;  %v3037_v22 = vmul.f32 %v903_v24, %v2927_v30 }
 0x15f   : > { %3761 = vst [vmem:[#allocation36_spill] sm:$0xff] %v3024_v4  ;;  %v3026_v46 = vpop.eup %2316  ;;  %v3034_v28 = vadd.f32 %v606_v3, %v2819_v41  ;;  %v910_v18 = vmul.f32 %v846_v58, %v2972_v16  ;;  %v851_v53 = vmul.f32 0.044715, %v3021_v1  ;;  %v852_v20 = vmul.f32 0.044715, %v3024_v4 }
 0x160   : > { %v608_v27 = vpop.f32.mrf.mxu0  ;;  %3762 = vst [vmem:[#allocation37_spill] sm:$0xff] %v3031_v21  ;;  %3764 = vst [vmem:[#allocation39_spill] sm:$0xff] %v3037_v22  ;;  %v721_v60 = vpop.f32.mrf.mxu1  ;;  %v909_v2 = vmul.f32 %v845_v9, %v2982_v40  ;;  %v911_v48 = vmul.f32 %v847_v61, %v2996_v51  ;;  %v854_v35 = vmul.f32 0.044715, %v3031_v21  ;;  %v3047_v3 = vmul.f32 %v904_v45, %v2930_v32 }
 0x161   : > { %3763 = vst [vmem:[#allocation38_spill] sm:$0xff] %v3034_v28  ;;  %v853_v39 = vmul.f32 0.044715, %v3034_v28  ;;  %v3050_v24 = vmul.f32 %v906_v56, %v2940_v43  ;;  %v912_v58 = vmul.f32 %v848_v13, %v3002_v55  ;;  %v914_v22 = vmul.f32 %v850_v15, %v3008_v47 }
 0x162   : > { %3765 = vst [vmem:[#allocation40_spill] sm:$0xff] %v3047_v3  ;;  %v610_v30 = vpop.f32.mrf.mxu0  ;;  %v3055_v19 = vmul.f32 %v905_v23, %v2948_v54  ;;  %v3058_v61 = vmul.f32 %v907_v7, %v2954_v62  ;;  %v3061_v9 = vmul.f32 %v908_v26, %v2962_v10  ;;  %v913_v45 = vmul.f32 %v849_v17, %v3014_v63  ;;  %v723_v23 = vpop.f32.mrf.mxu1 }
 0x163   : > { %3766 = vst [vmem:[#allocation41_spill] sm:$0xff] %v3050_v24  ;;  %v3065_v3 = vmul.f32 %v910_v18, %v2972_v16  ;;  %v915_v56 = vmul.f32 %v851_v53, %v3021_v1  ;;  %v916_v13 = vmul.f32 %v852_v20, %v3024_v4  ;;  %v3070_v15 = vadd.f32 %v719_v14, %v2822_v42 }
 0x164   : > { %v3073_v24 = vmul.f32 %v909_v2, %v2982_v40  ;;  %v3076_v7 = vmul.f32 %v911_v48, %v2996_v51  ;;  %v918_v26 = vmul.f32 %v854_v35, %v3031_v21  ;;  %v917_v17 = vmul.f32 %v853_v39, %v3034_v28  ;;  %v614_v2 = vpop.f32.mrf.mxu0 }
 0x165   : > { %3767 = vst [vmem:[#allocation42_spill] sm:$0xff] %v3065_v3  ;;  %3768 = vst [vmem:[#allocation43_spill] sm:$0xff] %v3070_v15  ;;  %v3081_v18 = vmul.f32 %v912_v58, %v3002_v55  ;;  %v3084_v53 = vmul.f32 %v914_v22, %v3008_v47  ;;  %v3087_v14 = vadd.f32 %v608_v27, %v2813_v37 }
 0x166   : > { %v3090_v20 = vadd.f32 %v721_v60, %v2816_v38  ;;  %v3093_v48 = vmul.f32 %v913_v45, %v3014_v63  ;;  %v3096_v35 = vadd.f32 %v610_v30, %v2819_v41  ;;  %v1013_v39 = vadd.f32 %v2870_v34, %v2827_v49 }
 0x167   : > { %3769 = vst [vmem:[#allocation44_spill] sm:$0xff] %v3084_v53  ;;  %3770 = vst [vmem:[#allocation45_spill] sm:$0xff] %v3087_v14  ;;  %v1017_v22 = vadd.f32 %v2894_v59, %v2837_v6  ;;  %v3103_v58 = vmul.f32 %v915_v56, %v3021_v1  ;;  %v3106_v27 = vmul.f32 %v916_v13, %v3024_v4  ;;  %v855_v60 = vmul.f32 0.044715, %v3070_v15  ;;  %v727_v53 = vpop.f32.mrf.mxu1 }
 0x168   : > { %3771 = vst [vmem:[#allocation46_spill] sm:$0xff] %v3090_v20  ;;  %v3110_v45 = vadd.f32 %v723_v23, %v2822_v42  ;;  %v3113_v30 = vmul.f32 %v918_v26, %v3031_v21  ;;  %v3116_v49 = vmul.f32 %v917_v17, %v3034_v28  ;;  %v1077_v34 = vmul.f32 0.7978846, %v1013_v39 }
 0x169   : > { %3772 = vst [vmem:[#allocation47_spill] sm:$0xff] %v3106_v27  ;;  %v1081_v59 = vmul.f32 0.7978846, %v1017_v22  ;;  %v856_v56 = vmul.f32 0.044715, %v3087_v14  ;;  %v1015_v13 = vadd.f32 %v2877_v44, %v2830_v50  ;;  %v1019_v23 = vadd.f32 %v2911_v5, %v2840_v8  ;;  %v616_v27 = vpop.f32.mrf.mxu0  ;;  %v729_v21 = vpop.f32.mrf.mxu1 }
 0x16a   : > { %3773 = vst [vmem:[#allocation48_spill] sm:$0xff] %v3110_v45  ;;  %3774 = vst [vmem:[#allocation49_spill] sm:$0xff] %v3113_v30  ;;  %v858_v47 = vmul.f32 0.044715, %v3090_v20  ;;  %v857_v4 = vmul.f32 0.044715, %v3096_v35  ;;  %2318 = vtanh.f32 %v1077_v34  ;;  %v3126_v26 = vadd.f32 %v614_v2, %v2813_v37 }
 0x16b   : > { %3775 = vst [vmem:[#allocation50_spill] sm:$0xff] %v3116_v49  ;;  %v3129_v17 = vadd.f32 %v727_v53, %v2816_v38  ;;  %v859_v39 = vmul.f32 0.044715, %v3110_v45  ;;  %2320 = vtanh.f32 %v1081_v59  ;;  %v1079_v22 = vmul.f32 0.7978846, %v1015_v13  ;;  %v618_v59 = vpop.f32.mrf.mxu0 }
 0x16c   : > { %3776 = vst [vmem:[#allocation51_spill] sm:$0xff] %v3126_v26  ;;  %v1083_v30 = vmul.f32 0.7978846, %v1019_v23  ;;  %v919_v50 = vmul.f32 %v855_v60, %v3070_v15  ;;  %v3134_v44 = vmul.f32 0.5, %v2837_v6  ;;  %v860_v5 = vmul.f32 0.044715, %v3126_v26 }
 0x16d   : > { %3777 = vst [vmem:[#allocation52_spill] sm:$0xff] %v3129_v17  ;;  %v862_v34 = vmul.f32 0.044715, %v3129_v17  ;;  %v920_v2 = vmul.f32 %v856_v56, %v3087_v14  ;;  %2322 = vtanh.f32 %v1079_v22  ;;  %v1208_v53 = vadd.f32 1.0, %v3016_v52  ;;  %v731_v52 = vpop.f32.mrf.mxu1 }
 0x16e   : > { %v3141_v49 = vadd.f32 %v616_v27, %v2819_v41  ;;  %v922_v13 = vmul.f32 %v858_v47, %v3090_v20  ;;  %v921_v60 = vmul.f32 %v857_v4, %v3096_v35  ;;  %2324 = vtanh.f32 %v1083_v30 }
 0x16f   : > { %v1210_v6 = vadd.f32 1.0, %v3026_v46  ;;  %v923_v23 = vmul.f32 %v859_v39, %v3110_v45  ;;  %v1204_v28 = vadd.f32 1.0, %v2964_v12  ;;  %v1206_v56 = vadd.f32 1.0, %v2984_v29 }
 0x170   : > { %3778 = vst [vmem:[#allocation53_spill] sm:$0xff] %v3141_v49  ;;  %v861_v22 = vmul.f32 0.044715, %v3141_v49  ;;  %v924_v27 = vmul.f32 %v860_v5, %v3126_v26  ;;  %v926_v3 = vmul.f32 %v862_v34, %v3129_v17  ;;  %v3153_v47 = vadd.f32 %v729_v21, %v2822_v42 }
 0x171   : > { %v3156_v4 = vadd.f32 %v618_v59, %v2813_v37  ;;  %v3159_v46 = vmul.f32 %v919_v50, %v3070_v15  ;;  %v3162_v12 = vmul.f32 %v920_v2, %v3087_v14  ;;  %v763_v29 = vmul.f32 0.5, %v2840_v8  ;;  %v620_v50 = vpop.f32.mrf.mxu0  ;;  %v733_v59 = vpop.f32.mrf.mxu1  ;;  %v3795_v14 = vld [vmem:[#allocation14_spill] sm:$0xff] }
 0x172   : > { %v3166_v30 = vmul.f32 %v1208_v53, %v2865_v31  ;;  %v3169_v39 = vmul.f32 %v922_v13, %v3090_v20  ;;  %v3172_v21 = vmul.f32 %v1210_v6, %v2867_v33  ;;  %v925_v5 = vmul.f32 %v861_v22, %v3141_v49  ;;  %v3792_v20 = vld [vmem:[#allocation20_spill] sm:$0xff] }
 0x173   : > { %3779 = vst [vmem:[#allocation54_spill] sm:$0xff] %v3156_v4  ;;  %3780 = vst [vmem:[#allocation55_spill] sm:$0xff] %v3159_v46  ;;  %v3176_v34 = vadd.f32 %v731_v52, %v2816_v38  ;;  %v3179_v2 = vmul.f32 %v921_v60, %v3096_v35  ;;  %v3182_v8 = vmul.f32 %v923_v23, %v3110_v45  ;;  %v863_v6 = vmul.f32 0.044715, %v3153_v47 }
 0x174   : > { %3781 = vst [vmem:[#allocation56_spill] sm:$0xff] %v3162_v12  ;;  %3782 = vst [vmem:[#allocation57_spill] sm:$0xff] %v3169_v39  ;;  %v1268_v31 = vmul.f32 %v1204_v28, %v2842_v11  ;;  %v3186_v53 = vmul.f32 %v1206_v56, %v2844_v0  ;;  %v3189_v33 = vmul.f32 %v924_v27, %v3126_v26  ;;  %v864_v60 = vmul.f32 0.044715, %v3156_v4  ;;  %v3788_v0 = vld [vmem:[#allocation30_spill] sm:$0xff]  ;;  %v3790_v26 = vld [vmem:[#allocation17_spill] sm:$0xff] }
 0x175   : > { %3783 = vst [vmem:[#allocation58_spill] sm:$0xff] %v3176_v34  ;;  %3784 = vst [vmem:[#allocation59_spill] sm:$0xff] %v3179_v2  ;;  %v3192_v13 = vmul.f32 %v926_v3, %v3129_v17  ;;  %v3198_v23 = vadd.f32 %v620_v50, %v2819_v41  ;;  %v1021_v11 = vadd.f32 %v2936_v36, %v2860_v25  ;;  %v866_v52 = vmul.f32 0.044715, %v3176_v34 }
 0x176   : > { %3785 = vst [vmem:[#allocation60_spill] sm:$0xff] %v3182_v8  ;;  %3786 = vst [vmem:[#allocation61_spill] sm:$0xff] %v3189_v33  ;;  %v1332_v22 = vpack.c.bf16 %v3166_v30, %v1268_v31  ;;  %v1025_v28 = vadd.f32 %v3788_v0, %v2891_v57  ;;  %v3207_v3 = vmul.f32 %v925_v5, %v3141_v49  ;;  %v3214_v50 = vmul.f32 0.5, %v2860_v25  ;;  %v737_v49 = vpop.f32.mrf.mxu1 }
 0x177   : > { %3787 = vst [vmem:[#allocation62_spill] sm:$0xff] %v3192_v13  ;;  %v3211_v27 = vadd.f32 %v733_v59, %v2822_v42  ;;  %v2319_v30 = vpop.eup %2318  ;;  %v3217_v36 = vmul.f32 0.5, %v2891_v57  ;;  %v1085_v31 = vmul.f32 0.7978846, %v1021_v11  ;;  %v624_v13 = vpop.f32.mrf.mxu0  ;;  %v927_v5 = vmul.f32 %v863_v6, %v3153_v47  ;;  %v3793_v57 = vld [vmem:[#allocation31_spill] sm:$0xff] }
 0x178   : > { %3789 = vst [vmem:[#allocation30_spill] sm:$0xff] %v3207_v3  ;;  %v1089_v0 = vmul.f32 0.7978846, %v1025_v28  ;;  %v2321_v17 = vpop.eup %2320  ;;  %v1205_v56 = vadd.f32 1.0, %v2319_v30  ;;  %v928_v33 = vmul.f32 %v864_v60, %v3156_v4  ;;  %v3791_v3 = vld [vmem:[#allocation27_spill] sm:$0xff]  ;;  %v1027_v12 = vadd.f32 %v3793_v57, %v3792_v20 }
 0x179   : > { %v1023_v59 = vadd.f32 %v3791_v3, %v3790_v26  ;;  %v1209_v39 = vadd.f32 1.0, %v2321_v17  ;;  %v865_v25 = vmul.f32 0.044715, %v3198_v23  ;;  %2326 = vtanh.f32 %v1085_v31  ;;  %v626_v46 = vpop.f32.mrf.mxu0 }
 0x17a   : > { %v2323_v11 = vpop.eup %2322  ;;  %v867_v28 = vmul.f32 0.044715, %v3211_v27  ;;  %2328 = vtanh.f32 %v1089_v0  ;;  %v3228_v6 = vadd.f32 %v624_v13, %v2813_v37  ;;  %v1269_v8 = vmul.f32 %v1205_v56, %v3795_v14  ;;  %v739_v0 = vpop.f32.mrf.mxu1  ;;  %v3798_v14 = vld [vmem:[#allocation16_spill] sm:$0xff]  ;;  %v3799_v56 = vld [vmem:[#allocation13_spill] sm:$0xff] }
 0x17b   : > { %v1087_v30 = vmul.f32 0.7978846, %v1023_v59  ;;  %v2325_v60 = vpop.eup %2324  ;;  %v1273_v3 = vmul.f32 %v1209_v39, %v3134_v44  ;;  %v1207_v17 = vadd.f32 1.0, %v2323_v11  ;;  %v1091_v45 = vmul.f32 0.7978846, %v1027_v12 }
 0x17c   : > { %3794 = vst [vmem:[#allocation17_spill] sm:$0xff] %v3228_v6  ;;  %v1211_v31 = vadd.f32 1.0, %v2325_v60  ;;  %v930_v15 = vmul.f32 %v866_v52, %v3176_v34  ;;  %v3234_v57 = vadd.f32 %v737_v49, %v2816_v38  ;;  %v3237_v13 = vmul.f32 %v927_v5, %v3153_v47  ;;  %v3800_v52 = vld [vmem:[#allocation24_spill] sm:$0xff] }
 0x17d   : > { %2330 = vtanh.f32 %v1087_v30  ;;  %v1333_v59 = vpack.c.bf16 %v1273_v3, %v1269_v8  ;;  %v3240_v2 = vmul.f32 0.5, %v3790_v26  ;;  %v1271_v44 = vmul.f32 %v1207_v17, %v3798_v14  ;;  %v3802_v30 = vld [vmem:[#allocation18_spill] sm:$0xff]  ;;  %v3803_v26 = vld [vmem:[#allocation28_spill] sm:$0xff] }
 0x17e   : > { %3796 = vst [vmem:[#allocation27_spill] sm:$0xff] %v3234_v57  ;;  %3797 = vst [vmem:[#allocation20_spill] sm:$0xff] %v3237_v13  ;;  %2332 = vtanh.f32 %v1091_v45  ;;  %v1275_v12 = vmul.f32 %v1211_v31, %v763_v29  ;;  %v868_v39 = vmul.f32 0.044715, %v3228_v6  ;;  %v1020_v11 = vadd.f32 %v3800_v52, %v3799_v56  ;;  %v628_v45 = vpop.f32.mrf.mxu0  ;;  %v3804_v31 = vld [vmem:[#allocation15_spill] sm:$0xff]  ;;  %v3805_v14 = vld [vmem:[#allocation26_spill] sm:$0xff] }
 0x17f   : > { %1658 = vmatprep.mubr.bf16.mxu0 %v1333_v59  ;;  %v3247_v49 = vmul.f32 %v928_v33, %v3156_v4  ;;  %v929_v8 = vmul.f32 %v865_v25, %v3198_v23  ;;  %v931_v5 = vmul.f32 %v867_v28, %v3211_v27  ;;  %v1024_v60 = vadd.f32 %v3803_v26, %v3802_v30  ;;  %v741_v59 = vpop.f32.mrf.mxu1  ;;  %v3806_v33 = vld [vmem:[#allocation19_spill] sm:$0xff] }
 0x180   : > { %v1335_v3 = vpack.c.bf16 %v1275_v12, %v1271_v44  ;;  %1659 = vmatmul.mubr.bf16.vlgmr.msra.gmra.mxu0 %v1332_v22  ;;  %v870_v29 = vmul.f32 0.044715, %v3234_v57  ;;  %v1084_v17 = vmul.f32 0.7978846, %v1020_v11  ;;  %v1022_v52 = vadd.f32 %v3805_v14, %v3804_v31 }
 0x181   : > { %3801 = vst [vmem:[#allocation31_spill] sm:$0xff] %v3247_v49  ;;  %v1088_v13 = vmul.f32 0.7978846, %v1024_v60  ;;  %v3807_v49 = vld [vmem:[#allocation29_spill] sm:$0xff]  ;;  %v3259_v25 = vadd.f32 %v626_v46, %v2819_v41  ;;  %v3262_v28 = vadd.f32 %v739_v0, %v2822_v42  ;;  %v932_v22 = vmul.f32 %v868_v39, %v3228_v6 }
 0x182   : > { %v1026_v4 = vadd.f32 %v3807_v49, %v3806_v33  ;;  %1755 = vmatprep.mubr.bf16.mxu1 %v1335_v3  ;;  %2334 = vtanh.f32 %v1084_v17  ;;  %v1086_v44 = vmul.f32 0.7978846, %v1022_v52  ;;  %v3266_v12 = vadd.f32 %v628_v45, %v2813_v37  ;;  %v630_v45 = vpop.f32.mrf.mxu0 }
 0x183   : > { %3808 = vst [vmem:[#allocation14_spill] sm:$0xff] %v3262_v28  ;;  %v3810_v11 = vpack.c.bf16 %v3172_v21, %v3186_v53  ;;  %v3272_v49 = vmul.f32 %v930_v15, %v3176_v34  ;;  %2336 = vtanh.f32 %v1088_v13  ;;  %v3275_v0 = vadd.f32 %v741_v59, %v2816_v38 }
 0x184   : > { %3809 = vst [vmem:[#allocation16_spill] sm:$0xff] %v3266_v12  ;;  %v1090_v46 = vmul.f32 0.7978846, %v1026_v4  ;;  %v771_v26 = vmul.f32 0.5, %v3792_v20  ;;  %v934_v39 = vmul.f32 %v870_v29, %v3234_v57  ;;  %2338 = vtanh.f32 %v1086_v44 }
 0x185   : > { %1756 = vmatmul.mubr.bf16.vlgmr.msra.gmra.mxu1 %v3810_v11  ;;  %3811 = vst [vmem:[#allocation13_spill] sm:$0xff] %v3272_v49  ;;  %v869_v60 = vmul.f32 0.044715, %v3259_v25  ;;  %v3281_v3 = vmul.f32 %v929_v8, %v3198_v23  ;;  %v871_v15 = vmul.f32 0.044715, %v3262_v28  ;;  %v3286_v53 = vmul.f32 %v931_v5, %v3211_v27  ;;  %v743_v8 = vpop.f32.mrf.mxu1 }
 0x186   : > { %2340 = vtanh.f32 %v1090_v46  ;;  %v872_v21 = vmul.f32 0.044715, %v3266_v12  ;;  %v2327_v4 = vpop.eup %2326  ;;  %v3289_v20 = vmul.f32 %v932_v22, %v3228_v6  ;;  %v3292_v13 = vmul.f32 0.5, %v3799_v56 }
 0x187   : > { %3812 = vst [vmem:[#allocation24_spill] sm:$0xff] %v3286_v53  ;;  %v3295_v29 = vmul.f32 0.5, %v3802_v30  ;;  %v2329_v17 = vpop.eup %2328  ;;  %v1213_v14 = vadd.f32 1.0, %v2327_v4  ;;  %v3298_v52 = vmul.f32 0.5, %v3804_v31  ;;  %v874_v59 = vmul.f32 0.044715, %v3275_v0 }
 0x188   : > { %3813 = vst [vmem:[#allocation18_spill] sm:$0xff] %v3289_v20  ;;  %v3302_v5 = vadd.f32 %v630_v45, %v2819_v41  ;;  %v1217_v44 = vadd.f32 1.0, %v2329_v17  ;;  %v3305_v22 = vmul.f32 %v934_v39, %v3234_v57  ;;  %v3308_v56 = vmul.f32 0.5, %v3806_v33  ;;  %v3815_v20 = vld [vmem:[#allocation23_spill] sm:$0xff]  ;;  %v3816_v45 = vld [vmem:[#allocation34_spill] sm:$0xff] }
 0x189   : > { %v933_v30 = vmul.f32 %v869_v60, %v3259_v25  ;;  %v935_v46 = vmul.f32 %v871_v15, %v3262_v28  ;;  %v936_v31 = vmul.f32 %v872_v21, %v3266_v12  ;;  %v3314_v4 = vadd.f32 %v743_v8, %v2822_v42  ;;  %v634_v8 = vpop.f32.mrf.mxu0 }
 0x18a   : > { %3814 = vst [vmem:[#allocation28_spill] sm:$0xff] %v3305_v22  ;;  %v2331_v11 = vpop.eup %2330  ;;  %v1029_v6 = vadd.f32 %v3816_v45, %v3815_v20  ;;  %v1277_v39 = vmul.f32 %v1213_v14, %v3214_v50  ;;  %v1281_v22 = vmul.f32 %v1217_v44, %v3217_v36  ;;  %v1033_v60 = vadd.f32 %v3055_v19, %v2948_v54  ;;  %v3817_v36 = vld [vmem:[#allocation25_spill] sm:$0xff]  ;;  %v3818_v44 = vld [vmem:[#allocation39_spill] sm:$0xff] }
 0x18b   : > { %v2333_v17 = vpop.eup %2332  ;;  %v1215_v33 = vadd.f32 1.0, %v2331_v11  ;;  %v938_v15 = vmul.f32 %v874_v59, %v3275_v0  ;;  %v873_v21 = vmul.f32 0.044715, %v3302_v5  ;;  %v3326_v45 = vmul.f32 0.5, %v3815_v20  ;;  %v747_v59 = vpop.f32.mrf.mxu1 }
 0x18c   : > { %v1219_v57 = vadd.f32 1.0, %v2333_v17  ;;  %v1093_v49 = vmul.f32 0.7978846, %v1029_v6  ;;  %v1337_v34 = vpack.c.bf16 %v1281_v22, %v1277_v39  ;;  %v1097_v50 = vmul.f32 0.7978846, %v1033_v60  ;;  %v636_v39 = vpop.f32.mrf.mxu0  ;;  %v3821_v60 = vld [vmem:[#allocation21_spill] sm:$0xff] }
 0x18d   : > { %v1279_v53 = vmul.f32 %v1215_v33, %v3240_v2  ;;  %v1031_v11 = vadd.f32 %v3818_v44, %v3817_v36  ;;  %v1035_v19 = vadd.f32 %v3058_v61, %v2954_v62  ;;  %v3333_v6 = vmul.f32 %v933_v30, %v3259_v25 }
 0x18e   : > { %v1283_v14 = vmul.f32 %v1219_v57, %v771_v26  ;;  %2342 = vtanh.f32 %v1093_v49  ;;  %1666 = vmatprep.mubr.bf16.mxu0 %v1337_v34  ;;  %v875_v22 = vmul.f32 0.044715, %v3314_v4  ;;  %v3337_v2 = vadd.f32 %v634_v8, %v2813_v37 }
 0x18f   : > { %2344 = vtanh.f32 %v1097_v50  ;;  %v2335_v20 = vpop.eup %2334  ;;  %v3340_v49 = vmul.f32 %v935_v46, %v3262_v28  ;;  %v1095_v26 = vmul.f32 0.7978846, %v1031_v11  ;;  %v1099_v17 = vmul.f32 0.7978846, %v1035_v19  ;;  %v3822_v50 = vld [vmem:[#allocation32_spill] sm:$0xff] }
 0x190   : > { %v1339_v57 = vpack.c.bf16 %v1283_v14, %v1279_v53  ;;  %v2337_v61 = vpop.eup %2336  ;;  %v1212_v33 = vadd.f32 1.0, %v2335_v20  ;;  %v3343_v34 = vmul.f32 %v936_v31, %v3266_v12  ;;  %v3346_v30 = vadd.f32 %v747_v59, %v2816_v38  ;;  %v3823_v14 = vld [vmem:[#allocation40_spill] sm:$0xff] }
 0x191   : > { %3819 = vst [vmem:[#allocation15_spill] sm:$0xff] %v3340_v49  ;;  %v1028_v8 = vadd.f32 %v3822_v50, %v3821_v60  ;;  %v2339_v44 = vpop.eup %2338  ;;  %v1216_v53 = vadd.f32 1.0, %v2337_v61  ;;  %v937_v46 = vmul.f32 %v873_v21, %v3302_v5  ;;  %2346 = vtanh.f32 %v1095_v26  ;;  %v638_v49 = vpop.f32.mrf.mxu0 }
 0x192   : > { %3820 = vst [vmem:[#allocation26_spill] sm:$0xff] %v3343_v34  ;;  %1763 = vmatprep.mubr.bf16.mxu1 %v1339_v57  ;;  %v1032_v11 = vadd.f32 %v3823_v14, %v2930_v32  ;;  %v1214_v20 = vadd.f32 1.0, %v2339_v44  ;;  %v939_v31 = vmul.f32 %v875_v22, %v3314_v4  ;;  %2348 = vtanh.f32 %v1099_v17  ;;  %v749_v34 = vpop.f32.mrf.mxu1 }
 0x193   : > { %v2341_v19 = vpop.eup %2340  ;;  %v876_v59 = vmul.f32 0.044715, %v3337_v2  ;;  %v1276_v12 = vmul.f32 %v1212_v33, %v3292_v13  ;;  %v1280_v50 = vmul.f32 %v1216_v53, %v3295_v29  ;;  %v1092_v61 = vmul.f32 0.7978846, %v1028_v8  ;;  %v3824_v13 = vld [vmem:[#allocation22_spill] sm:$0xff]  ;;  %v3825_v29 = vld [vmem:[#allocation33_spill] sm:$0xff] }
 0x194   : > { %v1218_v57 = vadd.f32 1.0, %v2341_v19  ;;  %v3358_v21 = vmul.f32 %v938_v15, %v3275_v0  ;;  %v777_v26 = vmul.f32 0.5, %v2948_v54  ;;  %v878_v44 = vmul.f32 0.044715, %v3346_v30  ;;  %v3826_v8 = vld [vmem:[#allocation41_spill] sm:$0xff]  ;;  %v751_v54 = vpop.f32.mrf.mxu1 }
 0x195   : > { %v1096_v14 = vmul.f32 0.7978846, %v1032_v11  ;;  %v1336_v22 = vpack.c.bf16 %v1280_v50, %v1276_v12  ;;  %v1278_v17 = vmul.f32 %v1214_v20, %v3298_v52  ;;  %2350 = vtanh.f32 %v1092_v61  ;;  %v640_v11 = vpop.f32.mrf.mxu0 }
 0x196   : > { %v1282_v28 = vmul.f32 %v1218_v57, %v3308_v56  ;;  %v1030_v33 = vadd.f32 %v3825_v29, %v3824_v13  ;;  %v1034_v53 = vadd.f32 %v3826_v8, %v2940_v43  ;;  %v3369_v15 = vadd.f32 %v636_v39, %v2819_v41 }
 0x197   : > { %2352 = vtanh.f32 %v1096_v14  ;;  %1667 = vmatmul.mubr.bf16.gmra.mxu0 %v1336_v22  ;;  %v3372_v12 = vmul.f32 %v937_v46, %v3302_v5  ;;  %v3375_v52 = vmul.f32 %v939_v31, %v3314_v4  ;;  %v940_v56 = vmul.f32 %v876_v59, %v3337_v2 }
 0x198   : > { %v1338_v19 = vpack.c.bf16 %v1282_v28, %v1278_v17  ;;  %v1094_v20 = vmul.f32 0.7978846, %v1030_v33  ;;  %v1098_v50 = vmul.f32 0.7978846, %v1034_v53  ;;  %v3379_v57 = vadd.f32 %v749_v34, %v2822_v42  ;;  %v753_v17 = vpop.f32.mrf.mxu1 }
 0x199   : > { %v3382_v39 = vadd.f32 %v638_v49, %v2813_v37  ;;  %v775_v28 = vmul.f32 0.5, %v3817_v36  ;;  %v942_v46 = vmul.f32 %v878_v44, %v3346_v30  ;;  %v877_v61 = vmul.f32 0.044715, %v3369_v15 }
 0x19a   : > { %1764 = vmatmul.mubr.bf16.gmra.mxu1 %v1338_v19  ;;  %v3388_v31 = vadd.f32 %v751_v54, %v2816_v38  ;;  %v779_v14 = vmul.f32 0.5, %v2954_v62  ;;  %v772_v22 = vmul.f32 0.5, %v3821_v60  ;;  %2354 = vtanh.f32 %v1094_v20 }
 0x19b   : > { %v2343_v59 = vpop.eup %2342  ;;  %v3393_v34 = vadd.f32 %v640_v11, %v2819_v41  ;;  %v776_v36 = vmul.f32 0.5, %v2930_v32  ;;  %v3397_v44 = vmul.f32 0.5, %v3824_v13  ;;  %2356 = vtanh.f32 %v1098_v50 }
 0x19c   : > { %v2345_v37 = vpop.eup %2344  ;;  %v1221_v49 = vadd.f32 1.0, %v2343_v59  ;;  %v3400_v29 = vmul.f32 %v940_v56, %v3337_v2  ;;  %v879_v62 = vmul.f32 0.044715, %v3379_v57  ;;  %v880_v60 = vmul.f32 0.044715, %v3382_v39 }
 0x19d   : > { %v1225_v38 = vadd.f32 1.0, %v2345_v37  ;;  %v3405_v41 = vmul.f32 %v942_v46, %v3346_v30  ;;  %v3408_v33 = vmul.f32 0.5, %v2940_v43  ;;  %v941_v32 = vmul.f32 %v877_v61, %v3369_v15 }
 0x19e   : > { %v882_v13 = vmul.f32 0.044715, %v3388_v31  ;;  %v2347_v8 = vpop.eup %2346  ;;  %v1285_v53 = vmul.f32 %v1221_v49, %v3326_v45  ;;  %v881_v19 = vmul.f32 0.044715, %v3393_v34  ;;  %v3415_v56 = vadd.f32 %v753_v17, %v2822_v42 }
 0x19f   : > { %v1289_v54 = vmul.f32 %v1225_v38, %v777_v26  ;;  %v2349_v11 = vpop.eup %2348  ;;  %v1223_v20 = vadd.f32 1.0, %v2347_v8  ;;  %v3418_v50 = vmul.f32 0.5, %v2982_v40  ;;  %v1037_v43 = vadd.f32 %v3073_v24, %v2982_v40 }
 0x1a0   : > { %v1041_v46 = vadd.f32 %v3093_v48, %v3014_v63  ;;  %v1227_v59 = vadd.f32 1.0, %v2349_v11  ;;  %v943_v45 = vmul.f32 %v879_v62, %v3379_v57  ;;  %v944_v26 = vmul.f32 %v880_v60, %v3382_v39 }
 0x1a1   : > { %v1341_v61 = vpack.c.bf16 %v1289_v54, %v1285_v53  ;;  %v3427_v42 = vmul.f32 %v941_v32, %v3369_v15  ;;  %v946_v37 = vmul.f32 %v882_v13, %v3388_v31  ;;  %v1101_v49 = vmul.f32 0.7978846, %v1037_v43 }
 0x1a2   : > { %v1105_v17 = vmul.f32 0.7978846, %v1041_v46  ;;  %v2351_v38 = vpop.eup %2350  ;;  %v1287_v8 = vmul.f32 %v1223_v20, %v775_v28  ;;  %v1291_v40 = vmul.f32 %v1227_v59, %v779_v14  ;;  %v1039_v24 = vadd.f32 %v3076_v7, %v2996_v51 }
 0x1a3   : > { %1674 = vmatprep.mubr.bf16.mxu0 %v1341_v61  ;;  %v1043_v48 = vadd.f32 %v3103_v58, %v3021_v1  ;;  %v1220_v53 = vadd.f32 1.0, %v2351_v38  ;;  %v3435_v60 = vmul.f32 %v881_v19, %v3393_v34  ;;  %2358 = vtanh.f32 %v1101_v49  ;;  %v3827_v61 = vld [vmem:[#allocation42_spill] sm:$0xff]  ;;  %v3829_v49 = vld [vmem:[#allocation44_spill] sm:$0xff] }
 0x1a4   : > { %v2353_v62 = vpop.eup %2352  ;;  %v1036_v32 = vadd.f32 %v3061_v9, %v2962_v10  ;;  %v1343_v13 = vpack.c.bf16 %v1291_v40, %v1287_v8  ;;  %2360 = vtanh.f32 %v1105_v17  ;;  %v1103_v28 = vmul.f32 0.7978846, %v1039_v24 }
 0x1a5   : > { %v1224_v54 = vadd.f32 1.0, %v2353_v62  ;;  %v3440_v14 = vmul.f32 %v943_v45, %v3379_v57  ;;  %v1107_v7 = vmul.f32 0.7978846, %v1043_v48  ;;  %v1040_v58 = vadd.f32 %v3081_v18, %v3002_v55  ;;  %v3828_v45 = vld [vmem:[#allocation35_spill] sm:$0xff]  ;;  %v3831_v62 = vld [vmem:[#allocation38_spill] sm:$0xff] }
 0x1a6   : > { %v1100_v11 = vmul.f32 0.7978846, %v1036_v32  ;;  %1771 = vmatprep.mubr.bf16.mxu1 %v1343_v13  ;;  %v1284_v20 = vmul.f32 %v1220_v53, %v772_v22  ;;  %v3445_v43 = vmul.f32 %v944_v26, %v3382_v39  ;;  %2362 = vtanh.f32 %v1103_v28  ;;  %v3832_v53 = vld [vmem:[#allocation50_spill] sm:$0xff]  ;;  %v3833_v13 = vld [vmem:[#allocation59_spill] sm:$0xff] }
 0x1a7   : > { %v1288_v19 = vmul.f32 %v1224_v54, %v776_v36  ;;  %v2355_v9 = vpop.eup %2354  ;;  %2364 = vtanh.f32 %v1107_v7  ;;  %v1104_v46 = vmul.f32 0.7978846, %v1040_v58  ;;  %v1038_v59 = vadd.f32 %v3827_v61, %v2972_v16 }
 0x1a8   : > { %v1042_v17 = vadd.f32 %v3829_v49, %v3828_v45  ;;  %v2357_v38 = vpop.eup %2356  ;;  %v1222_v18 = vadd.f32 1.0, %v2355_v9  ;;  %v3452_v40 = vmul.f32 0.044715, %v3415_v56  ;;  %2366 = vtanh.f32 %v1100_v11  ;;  %v3837_v49 = vld [vmem:[#allocation60_spill] sm:$0xff] }
 0x1a9   : > { %v1340_v8 = vpack.c.bf16 %v1288_v19, %v1284_v20  ;;  %v1226_v22 = vadd.f32 1.0, %v2357_v38  ;;  %2368 = vtanh.f32 %v1104_v46  ;;  %v1102_v36 = vmul.f32 0.7978846, %v1038_v59  ;;  %v3835_v19 = vld [vmem:[#allocation55_spill] sm:$0xff]  ;;  %v3836_v59 = vld [vmem:[#allocation48_spill] sm:$0xff] }
 0x1aa   : > { %v1106_v26 = vmul.f32 0.7978846, %v1042_v17  ;;  %v3455_v24 = vmul.f32 %v946_v37, %v3388_v31  ;;  %v785_v48 = vmul.f32 0.5, %v3014_v63  ;;  %v1045_v32 = vadd.f32 %v3832_v53, %v3831_v62  ;;  %v3834_v37 = vld [vmem:[#allocation43_spill] sm:$0xff] }
 0x1ab   : > { %1675 = vmatmul.mubr.bf16.gmra.mxu0 %v1340_v8  ;;  %v1049_v54 = vadd.f32 %v3833_v13, %v3096_v35  ;;  %v1286_v28 = vmul.f32 %v1222_v18, %v3397_v44  ;;  %v1290_v7 = vmul.f32 %v1226_v22, %v3408_v33  ;;  %v783_v58 = vmul.f32 0.5, %v2996_v51  ;;  %v3838_v33 = vld [vmem:[#allocation36_spill] sm:$0xff]  ;;  %v3839_v38 = vld [vmem:[#allocation47_spill] sm:$0xff]  ;;  %v3840_v8 = vld [vmem:[#allocation45_spill] sm:$0xff] }
 0x1ac   : > { %3830 = vst [vmem:[#allocation19_spill] sm:$0xff] %v3455_v24  ;;  %2370 = vtanh.f32 %v1102_v36  ;;  %v1109_v11 = vmul.f32 0.7978846, %v1045_v32  ;;  %v1047_v9 = vadd.f32 %v3835_v19, %v3834_v37  ;;  %v787_v46 = vmul.f32 0.5, %v3021_v1  ;;  %v3841_v18 = vld [vmem:[#allocation56_spill] sm:$0xff]  ;;  %v3842_v13 = vld [vmem:[#allocation37_spill] sm:$0xff] }
 0x1ad   : > { %2372 = vtanh.f32 %v1106_v26  ;;  %v1113_v20 = vmul.f32 0.7978846, %v1049_v54  ;;  %v1342_v63 = vpack.c.bf16 %v1290_v7, %v1286_v28  ;;  %v780_v61 = vmul.f32 0.5, %v2962_v10  ;;  %v3843_v54 = vld [vmem:[#allocation49_spill] sm:$0xff] }
 0x1ae   : > { %v1051_v17 = vadd.f32 %v3837_v49, %v3836_v59  ;;  %2374 = vtanh.f32 %v1109_v11  ;;  %v1111_v44 = vmul.f32 0.7978846, %v1047_v9  ;;  %v1044_v51 = vadd.f32 %v3839_v38, %v3838_v33  ;;  %v3844_v9 = vld [vmem:[#allocation46_spill] sm:$0xff] }
 0x1af   : > { %v1048_v22 = vadd.f32 %v3841_v18, %v3840_v8  ;;  %1772 = vmatmul.mubr.bf16.gmra.mxu1 %v1342_v63  ;;  %v784_v36 = vmul.f32 0.5, %v3002_v55  ;;  %v3477_v26 = vmul.f32 0.5, %v2972_v16  ;;  %2376 = vtanh.f32 %v1113_v20  ;;  %v3845_v63 = vld [vmem:[#allocation57_spill] sm:$0xff]  ;;  %v3847_v18 = vld [vmem:[#allocation30_spill] sm:$0xff] }
 0x1b0   : > { %v1115_v1 = vmul.f32 0.7978846, %v1051_v17  ;;  %v2359_v10 = vpop.eup %2358  ;;  %2378 = vtanh.f32 %v1111_v44  ;;  %v1108_v53 = vmul.f32 0.7978846, %v1044_v51  ;;  %v1046_v28 = vadd.f32 %v3843_v54, %v3842_v13  ;;  %v3846_v51 = vld [vmem:[#allocation53_spill] sm:$0xff] }
 0x1b1   : > { %v1112_v32 = vmul.f32 0.7978846, %v1048_v22  ;;  %v2361_v7 = vpop.eup %2360  ;;  %v1229_v11 = vadd.f32 1.0, %v2359_v10  ;;  %v786_v19 = vmul.f32 0.5, %v3828_v45  ;;  %v1050_v55 = vadd.f32 %v3845_v63, %v3844_v9 }
 0x1b2   : > { %2380 = vtanh.f32 %v1115_v1  ;;  %v1233_v49 = vadd.f32 1.0, %v2361_v7  ;;  %v789_v16 = vmul.f32 0.5, %v3831_v62  ;;  %v1110_v20 = vmul.f32 0.7978846, %v1046_v28 }
 0x1b3   : > { %2382 = vtanh.f32 %v1108_v53  ;;  %v2363_v17 = vpop.eup %2362  ;;  %v1293_v44 = vmul.f32 %v1229_v11, %v3418_v50  ;;  %v1114_v38 = vmul.f32 0.7978846, %v1050_v55  ;;  %v1053_v22 = vadd.f32 %v3847_v18, %v3846_v51 }
 0x1b4   : > { %2384 = vtanh.f32 %v1112_v32  ;;  %v2365_v10 = vpop.eup %2364  ;;  %v1297_v54 = vmul.f32 %v1233_v49, %v785_v48  ;;  %v1231_v45 = vadd.f32 1.0, %v2363_v17  ;;  %v1057_v1 = vadd.f32 %v3281_v3, %v3198_v23  ;;  %v3849_v17 = vld [vmem:[#allocation24_spill] sm:$0xff] }
 0x1b5   : > { %2386 = vtanh.f32 %v1110_v20  ;;  %v2367_v7 = vpop.eup %2366  ;;  %v1235_v63 = vadd.f32 1.0, %v2365_v10  ;;  %v793_v62 = vmul.f32 0.5, %v3096_v35  ;;  %v1117_v53 = vmul.f32 0.7978846, %v1053_v22  ;;  %v3848_v20 = vld [vmem:[#allocation20_spill] sm:$0xff] }
 0x1b6   : > { %2388 = vtanh.f32 %v1114_v38  ;;  %v2369_v28 = vpop.eup %2368  ;;  %v1345_v50 = vpack.c.bf16 %v1297_v54, %v1293_v44  ;;  %v1228_v32 = vadd.f32 1.0, %v2367_v7  ;;  %v791_v11 = vmul.f32 0.5, %v3834_v37 }
 0x1b7   : > { %v1121_v55 = vmul.f32 0.7978846, %v1057_v1  ;;  %v1295_v18 = vmul.f32 %v1231_v45, %v783_v58  ;;  %v1299_v24 = vmul.f32 %v1235_v63, %v787_v46  ;;  %v1232_v48 = vadd.f32 1.0, %v2369_v28  ;;  %v3851_v28 = vld [vmem:[#allocation61_spill] sm:$0xff] }
 0x1b8   : > { %2390 = vtanh.f32 %v1117_v53  ;;  %1682 = vmatprep.mubr.bf16.mxu0 %v1345_v50  ;;  %v795_v3 = vmul.f32 0.5, %v3836_v59  ;;  %v1055_v35 = vadd.f32 %v3848_v20, %v3153_v47  ;;  %v1059_v38 = vadd.f32 %v3849_v17, %v3211_v27  ;;  %v3850_v53 = vld [vmem:[#allocation51_spill] sm:$0xff] }
 0x1b9   : > { %v2371_v49 = vpop.eup %2370  ;;  %2392 = vtanh.f32 %v1121_v55  ;;  %v1347_v22 = vpack.c.bf16 %v1299_v24, %v1295_v18  ;;  %v1292_v10 = vmul.f32 %v1228_v32, %v780_v61  ;;  %v1296_v37 = vmul.f32 %v1232_v48, %v784_v36  ;;  %v3852_v55 = vld [vmem:[#allocation54_spill] sm:$0xff]  ;;  %v3853_v20 = vld [vmem:[#allocation31_spill] sm:$0xff] }
 0x1ba   : > { %v2373_v44 = vpop.eup %2372  ;;  %v1230_v54 = vadd.f32 1.0, %v2371_v49  ;;  %v788_v46 = vmul.f32 0.5, %v3838_v33  ;;  %v1119_v45 = vmul.f32 0.7978846, %v1055_v35  ;;  %v1123_v1 = vmul.f32 0.7978846, %v1059_v38 }
 0x1bb   : > { %v1234_v58 = vadd.f32 1.0, %v2373_v44  ;;  %v2375_v7 = vpop.eup %2374  ;;  %1779 = vmatprep.mubr.bf16.mxu1 %v1347_v22  ;;  %v1344_v59 = vpack.c.bf16 %v1296_v37, %v1292_v10  ;;  %v792_v63 = vmul.f32 0.5, %v3840_v8  ;;  %v1052_v50 = vadd.f32 %v3851_v28, %v3850_v53 }
 0x1bc   : > { %v1056_v17 = vadd.f32 %v3853_v20, %v3852_v55  ;;  %v2377_v24 = vpop.eup %2376  ;;  %v1294_v61 = vmul.f32 %v1230_v54, %v3477_v26  ;;  %v1237_v32 = vadd.f32 1.0, %v2375_v7  ;;  %2394 = vtanh.f32 %v1119_v45  ;;  %v3854_v26 = vld [vmem:[#allocation52_spill] sm:$0xff] }
 0x1bd   : > { %v1298_v36 = vmul.f32 %v1234_v58, %v786_v19  ;;  %v2379_v33 = vpop.eup %2378  ;;  %1683 = vmatmul.mubr.bf16.gmra.mxu0 %v1344_v59  ;;  %v1241_v18 = vadd.f32 1.0, %v2377_v24  ;;  %2396 = vtanh.f32 %v1123_v1  ;;  %v1116_v48 = vmul.f32 0.7978846, %v1052_v50  ;;  %v3855_v19 = vld [vmem:[#allocation62_spill] sm:$0xff]  ;;  %v3857_v59 = vld [vmem:[#allocation13_spill] sm:$0xff] }
 0x1be   : > { %v1120_v49 = vmul.f32 0.7978846, %v1056_v17  ;;  %v1301_v38 = vmul.f32 %v1237_v32, %v789_v16  ;;  %v1239_v44 = vadd.f32 1.0, %v2379_v33  ;;  %v790_v22 = vmul.f32 0.5, %v3842_v13  ;;  %v3856_v1 = vld [vmem:[#allocation58_spill] sm:$0xff] }
 0x1bf   : > { %v2381_v35 = vpop.eup %2380  ;;  %v1346_v8 = vpack.c.bf16 %v1298_v36, %v1294_v61  ;;  %v1305_v37 = vmul.f32 %v1241_v18, %v793_v62  ;;  %2398 = vtanh.f32 %v1116_v48  ;;  %v1054_v54 = vadd.f32 %v3855_v19, %v3854_v26 }
 0x1c0   : > { %v2383_v10 = vpop.eup %2382  ;;  %v1243_v28 = vadd.f32 1.0, %v2381_v35  ;;  %v1303_v45 = vmul.f32 %v1239_v44, %v791_v11  ;;  %2400 = vtanh.f32 %v1120_v49  ;;  %v1058_v50 = vadd.f32 %v3857_v59, %v3856_v1 }
 0x1c1   : > { %v2385_v58 = vpop.eup %2384  ;;  %1780 = vmatmul.mubr.bf16.gmra.mxu1 %v1346_v8  ;;  %v1236_v7 = vadd.f32 1.0, %v2383_v10  ;;  %v1349_v16 = vpack.c.bf16 %v1305_v37, %v1301_v38  ;;  %v1118_v13 = vmul.f32 0.7978846, %v1054_v54  ;;  %v794_v36 = vmul.f32 0.5, %v3844_v9  ;;  %v3858_v54 = vld [vmem:[#allocation14_spill] sm:$0xff] }
 0x1c2   : > { %v2387_v20 = vpop.eup %2386  ;;  %v1307_v17 = vmul.f32 %v1243_v28, %v795_v3  ;;  %v1240_v24 = vadd.f32 1.0, %v2385_v58  ;;  %v1122_v33 = vmul.f32 0.7978846, %v1058_v50  ;;  %v1009_v35 = vmul.f32 %v3435_v60, %v3393_v34  ;;  %v3859_v58 = vld [vmem:[#allocation15_spill] sm:$0xff] }
 0x1c3   : > { %v2389_v61 = vpop.eup %2388  ;;  %v1300_v62 = vmul.f32 %v1236_v7, %v788_v46  ;;  %v1238_v32 = vadd.f32 1.0, %v2387_v20  ;;  %1690 = vmatprep.mubr.bf16.mxu0 %v1349_v16  ;;  %2402 = vtanh.f32 %v1118_v13  ;;  %v1061_v3 = vadd.f32 %v3333_v6, %v3259_v25  ;;  %v3860_v20 = vld [vmem:[#allocation17_spill] sm:$0xff] }
 0x1c4   : > { %v1351_v18 = vpack.c.bf16 %v1307_v17, %v1303_v45  ;;  %v1304_v48 = vmul.f32 %v1240_v24, %v792_v63  ;;  %v1242_v11 = vadd.f32 1.0, %v2389_v61  ;;  %2404 = vtanh.f32 %v1122_v33 }
 0x1c5   : > { %v2391_v49 = vpop.eup %2390  ;;  %v1302_v8 = vmul.f32 %v1238_v32, %v790_v22  ;;  %v1065_v10 = vadd.f32 %v3372_v12, %v3302_v5  ;;  %v797_v63 = vmul.f32 0.5, %v3846_v51  ;;  %v801_v37 = vmul.f32 0.5, %v3198_v23 }
 0x1c6   : > { %v2393_v38 = vpop.eup %2392  ;;  %1787 = vmatprep.mubr.bf16.mxu1 %v1351_v18  ;;  %v1348_v46 = vpack.c.bf16 %v1304_v48, %v1300_v62  ;;  %v1306_v9 = vmul.f32 %v1242_v11, %v794_v36  ;;  %v1245_v44 = vadd.f32 1.0, %v2391_v49  ;;  %v1125_v19 = vmul.f32 0.7978846, %v1061_v3  ;;  %v3862_v62 = vld [vmem:[#allocation16_spill] sm:$0xff]  ;;  %v3863_v36 = vld [vmem:[#allocation26_spill] sm:$0xff] }
 0x1c7   : > { %v1249_v28 = vadd.f32 1.0, %v2393_v38  ;;  %v947_v60 = vmul.f32 %v3452_v40, %v3415_v56  ;;  %v1129_v6 = vmul.f32 0.7978846, %v1065_v10  ;;  %v1063_v45 = vadd.f32 %v3859_v58, %v3858_v54  ;;  %v3861_v40 = vld [vmem:[#allocation18_spill] sm:$0xff] }
 0x1c8   : > { %1691 = vmatmul.mubr.bf16.gmra.mxu0 %v1348_v46  ;;  %v1350_v22 = vpack.c.bf16 %v1306_v9, %v1302_v8  ;;  %v1309_v7 = vmul.f32 %v1245_v44, %v797_v63  ;;  %2406 = vtanh.f32 %v1125_v19  ;;  %v1067_v12 = vadd.f32 %v3375_v52, %v3314_v4  ;;  %v3864_v46 = vld [vmem:[#allocation27_spill] sm:$0xff]  ;;  %v3865_v9 = vld [vmem:[#allocation28_spill] sm:$0xff] }
 0x1c9   : > { %v1313_v59 = vmul.f32 %v1249_v28, %v801_v37  ;;  %v2395_v51 = vpop.eup %2394  ;;  %v799_v23 = vmul.f32 0.5, %v3153_v47  ;;  %2408 = vtanh.f32 %v1129_v6  ;;  %v1127_v50 = vmul.f32 0.7978846, %v1063_v45 }
 0x1ca   : > { %1788 = vmatmul.mubr.bf16.gmra.mxu1 %v1350_v22  ;;  %v1060_v16 = vadd.f32 %v3861_v40, %v3860_v20  ;;  %v2397_v17 = vpop.eup %2396  ;;  %v1247_v13 = vadd.f32 1.0, %v2395_v51  ;;  %v1131_v61 = vmul.f32 0.7978846, %v1067_v12  ;;  %v1064_v32 = vadd.f32 %v3863_v36, %v3862_v62 }
 0x1cb   : > { %v1353_v24 = vpack.c.bf16 %v1313_v59, %v1309_v7  ;;  %v803_v33 = vmul.f32 0.5, %v3211_v27  ;;  %v1251_v18 = vadd.f32 1.0, %v2397_v17  ;;  %2410 = vtanh.f32 %v1127_v50 }
 0x1cc   : > { %v1124_v52 = vmul.f32 0.7978846, %v1060_v16  ;;  %v2399_v48 = vpop.eup %2398  ;;  %v1311_v47 = vmul.f32 %v1247_v13, %v799_v23  ;;  %v796_v11 = vmul.f32 0.5, %v3850_v53  ;;  %2412 = vtanh.f32 %v1131_v61 }
 0x1cd   : > { %1698 = vmatprep.mubr.bf16.mxu0 %v1353_v24  ;;  %v1128_v49 = vmul.f32 0.7978846, %v1064_v32  ;;  %v2401_v8 = vpop.eup %2400  ;;  %v1315_v3 = vmul.f32 %v1251_v18, %v803_v33  ;;  %v1244_v38 = vadd.f32 1.0, %v2399_v48  ;;  %v1062_v44 = vadd.f32 %v3865_v9, %v3864_v46 }
 0x1ce   : > { %2414 = vtanh.f32 %v1124_v52  ;;  %v800_v10 = vmul.f32 0.5, %v3852_v55  ;;  %v1248_v27 = vadd.f32 1.0, %v2401_v8  ;;  %v1066_v63 = vadd.f32 %v3358_v21, %v3275_v0 }
 0x1cf   : > { %2416 = vtanh.f32 %v1128_v49  ;;  %v1011_v37 = vmul.f32 %v947_v60, %v3415_v56  ;;  %v1355_v28 = vpack.c.bf16 %v1315_v3, %v1311_v47  ;;  %v1308_v53 = vmul.f32 %v1244_v38, %v796_v11 }
 0x1d0   : > { %v1126_v19 = vmul.f32 0.7978846, %v1062_v44  ;;  %v2403_v22 = vpop.eup %2402  ;;  %v1312_v6 = vmul.f32 %v1248_v27, %v800_v10  ;;  %v1130_v58 = vmul.f32 0.7978846, %v1066_v63  ;;  %v1069_v45 = vadd.f32 %v3427_v42, %v3369_v15 }
 0x1d1   : > { %v1073_v7 = vadd.f32 %v1009_v35, %v3393_v34  ;;  %v2405_v59 = vpop.eup %2404  ;;  %1795 = vmatprep.mubr.bf16.mxu1 %v1355_v28  ;;  %v798_v55 = vmul.f32 0.5, %v3854_v26  ;;  %v802_v12 = vmul.f32 0.5, %v3856_v1  ;;  %v1246_v21 = vadd.f32 1.0, %v2403_v22 }
 0x1d2   : > { %2418 = vtanh.f32 %v1126_v19  ;;  %v1352_v60 = vpack.c.bf16 %v1312_v6, %v1308_v53  ;;  %v1250_v51 = vadd.f32 1.0, %v2405_v59  ;;  %v1133_v23 = vmul.f32 0.7978846, %v1069_v45 }
 0x1d3   : > { %2420 = vtanh.f32 %v1130_v58  ;;  %v805_v50 = vmul.f32 0.5, %v3259_v25  ;;  %v1137_v40 = vmul.f32 0.7978846, %v1073_v7  ;;  %v1071_v42 = vadd.f32 %v3440_v14, %v3379_v57 }
 0x1d4   : > { %v1075_v35 = vadd.f32 %v1011_v37, %v3415_v56  ;;  %1699 = vmatmul.mubr.bf16.gmra.mxu0 %v1352_v60  ;;  %v1310_v16 = vmul.f32 %v1246_v21, %v798_v55  ;;  %v1314_v17 = vmul.f32 %v1250_v51, %v802_v12  ;;  %v809_v26 = vmul.f32 0.5, %v3302_v5 }
 0x1d5   : > { %2422 = vtanh.f32 %v1133_v23  ;;  %v2407_v1 = vpop.eup %2406  ;;  %v1135_v24 = vmul.f32 0.7978846, %v1071_v42  ;;  %v1068_v61 = vadd.f32 %v3400_v29, %v3337_v2  ;;  %v807_v14 = vmul.f32 0.5, %v3858_v54  ;;  %v3866_v54 = vld [vmem:[#allocation19_spill] sm:$0xff] }
 0x1d6   : > { %2424 = vtanh.f32 %v1137_v40  ;;  %v1139_v13 = vmul.f32 0.7978846, %v1075_v35  ;;  %v2409_v25 = vpop.eup %2408  ;;  %v1354_v36 = vpack.c.bf16 %v1314_v17, %v1310_v16  ;;  %v1253_v32 = vadd.f32 1.0, %v2407_v1 }
 0x1d7   : > { %v1072_v33 = vadd.f32 %v3445_v43, %v3382_v39  ;;  %v1257_v18 = vadd.f32 1.0, %v2409_v25  ;;  %v811_v52 = vmul.f32 0.5, %v3314_v4  ;;  %2426 = vtanh.f32 %v1135_v24 }
 0x1d8   : > { %v1132_v5 = vmul.f32 0.7978846, %v1068_v61  ;;  %v2411_v48 = vpop.eup %2410  ;;  %1796 = vmatmul.mubr.bf16.gmra.mxu1 %v1354_v36  ;;  %v1317_v47 = vmul.f32 %v1253_v32, %v805_v50  ;;  %2428 = vtanh.f32 %v1139_v13  ;;  %v1070_v29 = vadd.f32 %v3405_v41, %v3346_v30 }
 0x1d9   : > { %v1136_v11 = vmul.f32 0.7978846, %v1072_v33  ;;  %v2413_v49 = vpop.eup %2412  ;;  %v1321_v8 = vmul.f32 %v1257_v18, %v809_v26  ;;  %v1255_v3 = vadd.f32 1.0, %v2411_v48  ;;  %v1074_v43 = vadd.f32 %v3866_v54, %v3388_v31 }
 0x1da   : > { %2430 = vtanh.f32 %v1132_v5  ;;  %v1259_v9 = vadd.f32 1.0, %v2413_v49  ;;  %v804_v4 = vmul.f32 0.5, %v3860_v20  ;;  %v1134_v44 = vmul.f32 0.7978846, %v1070_v29 }
 0x1db   : > { %v2415_v38 = vpop.eup %2414  ;;  %2432 = vtanh.f32 %v1136_v11  ;;  %v1357_v27 = vpack.c.bf16 %v1321_v8, %v1317_v47  ;;  %v808_v63 = vmul.f32 0.5, %v3862_v62  ;;  %v1138_v28 = vmul.f32 0.7978846, %v1074_v43 }
 0x1dc   : > { %v2417_v10 = vpop.eup %2416  ;;  %v1252_v37 = vadd.f32 1.0, %v2415_v38  ;;  %v1319_v41 = vmul.f32 %v1255_v3, %v807_v14  ;;  %v1323_v53 = vmul.f32 %v1259_v9, %v811_v52  ;;  %2434 = vtanh.f32 %v1134_v44 }
 0x1dd   : > { %v1256_v19 = vadd.f32 1.0, %v2417_v10  ;;  %1706 = vmatprep.mubr.bf16.mxu0 %v1357_v27  ;;  %2436 = vtanh.f32 %v1138_v28  ;;  %v806_v55 = vmul.f32 0.5, %v3864_v46  ;;  %v810_v62 = vmul.f32 0.5, %v3275_v0 }
 0x1de   : > { %v1359_v6 = vpack.c.bf16 %v1323_v53, %v1319_v41  ;;  %v1316_v58 = vmul.f32 %v1252_v37, %v804_v4  ;;  %v813_v40 = vmul.f32 0.5, %v3369_v15  ;;  %v817_v42 = vmul.f32 0.5, %v3393_v34  ;;  %v3867_v4 = vld [vmem:[#allocation12_spill] sm:$0xff] }
 0x1df   : > { %v2419_v22 = vpop.eup %2418  ;;  %v1320_v45 = vmul.f32 %v1256_v19, %v808_v63  ;;  %v815_v0 = vmul.f32 0.5, %v3379_v57  ;;  %v819_v61 = vmul.f32 0.5, %v3415_v56  ;;  %v812_v15 = vmul.f32 0.5, %v3337_v2 }
 0x1e0   : > { %v2421_v7 = vpop.eup %2420  ;;  %v1254_v20 = vadd.f32 1.0, %v2419_v22  ;;  %1803 = vmatprep.mubr.bf16.mxu1 %v1359_v6  ;;  %v816_v18 = vmul.f32 0.5, %v3382_v39  ;;  %v814_v56 = vmul.f32 0.5, %v3346_v30  ;;  %v818_v49 = vmul.f32 0.5, %v3388_v31  ;;  %v1428_v39 = vld [vmem:[%s3665_s4] sm:$0x1] }
 0x1e1   : > { %v1356_v59 = vpack.c.bf16 %v1320_v45, %v1316_v58  ;;  %v1258_v12 = vadd.f32 1.0, %v2421_v7  ;;  %v1429_v38 = vunpack.c.l.bf16 %v1428_v39 }
 0x1e2   : > { %v2423_v21 = vpop.eup %2422  ;;  %v1318_v51 = vmul.f32 %v1254_v20, %v806_v55 }
 0x1e3   : > { %v2425_v60 = vpop.eup %2424  ;;  %1707 = vmatmul.mubr.bf16.gmra.mxu0 %v1356_v59  ;;  %v1322_v23 = vmul.f32 %v1258_v12, %v810_v62  ;;  %v1261_v50 = vadd.f32 1.0, %v2423_v21  ;;  %v3573_v44 = vrot.slane %v1429_v38, %v3867_v4 }
 0x1e4   : > { %v1265_v35 = vadd.f32 1.0, %v2425_v60  ;;  %v2427_v16 = vpop.eup %2426 }
 0x1e5   : > { %v1358_v17 = vpack.c.bf16 %v1322_v23, %v1318_v51  ;;  %v2429_v26 = vpop.eup %2428  ;;  %v1325_v1 = vmul.f32 %v1261_v50, %v813_v40  ;;  %v1263_v46 = vadd.f32 1.0, %v2427_v16 }
 0x1e6   : > { %v1329_v24 = vmul.f32 %v1265_v35, %v817_v42  ;;  %v1267_v25 = vadd.f32 1.0, %v2429_v26 }
 0x1e7   : > { %v2431_v13 = vpop.eup %2430  ;;  %1804 = vmatmul.mubr.bf16.gmra.mxu1 %v1358_v17  ;;  %v1327_v34 = vmul.f32 %v1263_v46, %v815_v0 }
 0x1e8   : > { %v2433_v36 = vpop.eup %2432  ;;  %v1361_v32 = vpack.c.bf16 %v1329_v24, %v1325_v1  ;;  %v1260_v14 = vadd.f32 1.0, %v2431_v13  ;;  %v1331_v33 = vmul.f32 %v1267_v25, %v819_v61 }
 0x1e9   : > { %v1264_v52 = vadd.f32 1.0, %v2433_v36  ;;  %v2435_v5 = vpop.eup %2434 }
 0x1ea   : > { %1714 = vmatprep.mubr.bf16.mxu0 %v1361_v32  ;;  %v2437_v48 = vpop.eup %2436  ;;  %v1363_v47 = vpack.c.bf16 %v1331_v33, %v1327_v34  ;;  %v1324_v11 = vmul.f32 %v1260_v14, %v812_v15  ;;  %v1262_v57 = vadd.f32 1.0, %v2435_v5 }
 0x1eb   : > { %v1328_v29 = vmul.f32 %v1264_v52, %v816_v18  ;;  %v1266_v8 = vadd.f32 1.0, %v2437_v48 }
 0x1ec   : > { %1811 = vmatprep.mubr.bf16.mxu1 %v1363_v47  ;;  %v1326_v3 = vmul.f32 %v1262_v57, %v814_v56 }
 0x1ed   : > { %v1360_v2 = vpack.c.bf16 %v1328_v29, %v1324_v11  ;;  %v1330_v54 = vmul.f32 %v1266_v8, %v818_v49 }
 0x1ef   : > { %1715 = vmatmul.mubr.bf16.gmra.mxu0 %v1360_v2  ;;  %v1362_v43 = vpack.c.bf16 %v1330_v54, %v1326_v3 }
 0x1f1   : > { %1812 = vmatmul.mubr.bf16.gmra.mxu1 %v1362_v43 }
 0x240   : > { %v2042_v9 = vpop.f32.mrf.mxu0 }
 0x242   : > { %v2043_v30 = vpop.f32.mrf.mxu0 }
 0x243   : > { %v2044_v10 = vadd.f32 %v2043_v30, %v2042_v9 }
 0x244   : > { %v2045_v27 = vpop.f32.mrf.mxu0 }
 0x245   : > { %v2106_v31 = vpop.f32.mrf.mxu1  ;;  %v1661_v63 = vadd.f32 %v2044_v10, %v3573_v44 }
 0x246   : > { %v2046_v41 = vpop.f32.mrf.mxu0 }
 0x247   : > { %v2107_v37 = vpop.f32.mrf.mxu1  ;;  %v2047_v19 = vadd.f32 %v2046_v41, %v2045_v27 }
 0x248   : > { %v2108_v28 = vadd.f32 %v2107_v37, %v2106_v31 }
 0x249   : > { %v2109_v53 = vpop.f32.mrf.mxu1  ;;  %v1664_v6 = vadd.f32 %v2047_v19, %v3573_v44 }
 0x24a   : > { %v1758_v22 = vadd.f32 %v2108_v28, %v1661_v63 }
 0x24b   : > { %v2110_v58 = vpop.f32.mrf.mxu1 }
 0x24c   : > { %1820 = vst [vmem:[%s3579_s13] sm:$0xff] %v1758_v22  ;;  %v2111_v45 = vadd.f32 %v2110_v58, %v2109_v53 }
 0x24e   : > { %v1761_v7 = vadd.f32 %v2111_v45, %v1664_v6 }
 0x250   : > { %1821 = vst [vmem:[%s3579_s13 + $0x8] sm:$0xff] %v1761_v7 }
 0x257   : > { %v2048_v20 = vpop.f32.mrf.mxu0 }
 0x259   : > { %v2049_v55 = vpop.f32.mrf.mxu0 }
 0x25a   : > { %v2112_v59 = vpop.f32.mrf.mxu1  ;;  %v2050_v62 = vadd.f32 %v2049_v55, %v2048_v20 }
 0x25b   : > { %v2051_v21 = vpop.f32.mrf.mxu0 }
 0x25c   : > { %v2113_v12 = vpop.f32.mrf.mxu1  ;;  %v1669_v60 = vadd.f32 %v2050_v62, %v3573_v44 }
 0x25d   : > { %v2114_v51 = vadd.f32 %v2113_v12, %v2112_v59  ;;  %v2052_v50 = vpop.f32.mrf.mxu0 }
 0x25e   : > { %v2115_v23 = vpop.f32.mrf.mxu1  ;;  %v2053_v42 = vadd.f32 %v2052_v50, %v2051_v21 }
 0x25f   : > { %v1766_v40 = vadd.f32 %v2114_v51, %v1669_v60 }
 0x260   : > { %v2116_v35 = vpop.f32.mrf.mxu1  ;;  %v1672_v16 = vadd.f32 %v2053_v42, %v3573_v44 }
 0x261   : > { %1822 = vst [vmem:[%s3579_s13 + $0x10] sm:$0xff] %v1766_v40  ;;  %v2117_v17 = vadd.f32 %v2116_v35, %v2115_v23 }
 0x263   : > { %v1769_v26 = vadd.f32 %v2117_v17, %v1672_v16 }
 0x265   : > { %1823 = vst [vmem:[%s3579_s13 + $0x18] sm:$0xff] %v1769_v26 }
 0x26b   : > { %v2054_v1 = vpop.f32.mrf.mxu0 }
 0x26d   : > { %v2055_v24 = vpop.f32.mrf.mxu0 }
 0x26e   : > { %v2056_v46 = vadd.f32 %v2055_v24, %v2054_v1 }
 0x26f   : > { %v2057_v13 = vpop.f32.mrf.mxu0  ;;  %v2118_v0 = vpop.f32.mrf.mxu1 }
 0x270   : > { %v1677_v61 = vadd.f32 %v2056_v46, %v3573_v44 }
 0x271   : > { %v2058_v25 = vpop.f32.mrf.mxu0  ;;  %v2119_v36 = vpop.f32.mrf.mxu1 }
 0x272   : > { %v2059_v32 = vadd.f32 %v2058_v25, %v2057_v13  ;;  %v2120_v15 = vadd.f32 %v2119_v36, %v2118_v0 }
 0x273   : > { %v2121_v14 = vpop.f32.mrf.mxu1 }
 0x274   : > { %v1774_v34 = vadd.f32 %v2120_v15, %v1677_v61  ;;  %v1680_v33 = vadd.f32 %v2059_v32, %v3573_v44 }
 0x275   : > { %v2122_v18 = vpop.f32.mrf.mxu1 }
 0x276   : > { %1824 = vst [vmem:[%s3579_s13 + $0x20] sm:$0xff] %v1774_v34  ;;  %v2123_v52 = vadd.f32 %v2122_v18, %v2121_v14 }
 0x278   : > { %v1777_v5 = vadd.f32 %v2123_v52, %v1680_v33 }
 0x27a   : > { %1825 = vst [vmem:[%s3579_s13 + $0x28] sm:$0xff] %v1777_v5 }
 0x27d   : > { %v2060_v48 = vpop.f32.mrf.mxu0 }
 0x27f   : > { %v2061_v47 = vpop.f32.mrf.mxu0 }
 0x280   : > { %v2062_v29 = vadd.f32 %v2061_v47, %v2060_v48 }
 0x281   : > { %v2124_v11 = vpop.f32.mrf.mxu1  ;;  %v2063_v57 = vpop.f32.mrf.mxu0 }
 0x282   : > { %v1685_v56 = vadd.f32 %v2062_v29, %v3573_v44 }
 0x283   : > { %v2125_v49 = vpop.f32.mrf.mxu1  ;;  %v2064_v2 = vpop.f32.mrf.mxu0 }
 0x284   : > { %v2126_v8 = vadd.f32 %v2125_v49, %v2124_v11  ;;  %v2065_v54 = vadd.f32 %v2064_v2, %v2063_v57 }
 0x285   : > { %v2127_v3 = vpop.f32.mrf.mxu1 }
 0x286   : > { %v1782_v43 = vadd.f32 %v2126_v8, %v1685_v56  ;;  %v1688_v39 = vadd.f32 %v2065_v54, %v3573_v44 }
 0x287   : > { %v2128_v38 = vpop.f32.mrf.mxu1 }
 0x288   : > { %1826 = vst [vmem:[%s3579_s13 + $0x30] sm:$0xff] %v1782_v43  ;;  %v2129_v9 = vadd.f32 %v2128_v38, %v2127_v3  ;;  %v2066_v4 = vpop.f32.mrf.mxu0 }
 0x28a   : > { %v1785_v30 = vadd.f32 %v2129_v9, %v1688_v39  ;;  %v2130_v31 = vpop.f32.mrf.mxu1  ;;  %v2067_v10 = vpop.f32.mrf.mxu0 }
 0x28b   : > { %v2068_v27 = vadd.f32 %v2067_v10, %v2066_v4 }
 0x28c   : > { %1827 = vst [vmem:[%s3579_s13 + $0x38] sm:$0xff] %v1785_v30  ;;  %v2131_v63 = vpop.f32.mrf.mxu1  ;;  %v2069_v37 = vpop.f32.mrf.mxu0 }
 0x28d   : > { %v1693_v28 = vadd.f32 %v2068_v27, %v3573_v44  ;;  %v2132_v41 = vadd.f32 %v2131_v63, %v2130_v31 }
 0x28e   : > { %v2133_v53 = vpop.f32.mrf.mxu1  ;;  %v2070_v19 = vpop.f32.mrf.mxu0 }
 0x28f   : > { %v1790_v22 = vadd.f32 %v2132_v41, %v1693_v28  ;;  %v2071_v6 = vadd.f32 %v2070_v19, %v2069_v37 }
 0x290   : > { %v2134_v58 = vpop.f32.mrf.mxu1 }
 0x291   : > { %1828 = vst [vmem:[%s3579_s13 + $0x40] sm:$0xff] %v1790_v22  ;;  %v1696_v45 = vadd.f32 %v2071_v6, %v3573_v44  ;;  %v2135_v7 = vadd.f32 %v2134_v58, %v2133_v53 }
 0x293   : > { %v1793_v20 = vadd.f32 %v2135_v7, %v1696_v45 }
 0x294   : > { %v2072_v59 = vpop.f32.mrf.mxu0 }
 0x295   : > { %1829 = vst [vmem:[%s3579_s13 + $0x48] sm:$0xff] %v1793_v20 }
 0x296   : > { %v2073_v55 = vpop.f32.mrf.mxu0 }
 0x297   : > { %v2074_v62 = vadd.f32 %v2073_v55, %v2072_v59 }
 0x298   : > { %v2136_v12 = vpop.f32.mrf.mxu1  ;;  %v2075_v21 = vpop.f32.mrf.mxu0 }
 0x299   : > { %v1701_v60 = vadd.f32 %v2074_v62, %v3573_v44 }
 0x29a   : > { %v2137_v51 = vpop.f32.mrf.mxu1  ;;  %v2076_v23 = vpop.f32.mrf.mxu0 }
 0x29b   : > { %v2138_v50 = vadd.f32 %v2137_v51, %v2136_v12  ;;  %v2077_v40 = vadd.f32 %v2076_v23, %v2075_v21 }
 0x29c   : > { %v2139_v42 = vpop.f32.mrf.mxu1 }
 0x29d   : > { %v1798_v35 = vadd.f32 %v2138_v50, %v1701_v60  ;;  %v1704_v16 = vadd.f32 %v2077_v40, %v3573_v44 }
 0x29e   : > { %v2140_v17 = vpop.f32.mrf.mxu1 }
 0x29f   : > { %1830 = vst [vmem:[%s3579_s13 + $0x50] sm:$0xff] %v1798_v35  ;;  %v2141_v26 = vadd.f32 %v2140_v17, %v2139_v42 }
 0x2a1   : > { %v1801_v1 = vadd.f32 %v2141_v26, %v1704_v16 }
 0x2a3   : > { %v2078_v24 = vpop.f32.mrf.mxu0  ;;  %1831 = vst [vmem:[%s3579_s13 + $0x58] sm:$0xff] %v1801_v1 }
 0x2a5   : > { %v2079_v46 = vpop.f32.mrf.mxu0 }
 0x2a6   : > { %v2080_v13 = vadd.f32 %v2079_v46, %v2078_v24 }
 0x2a7   : > { %v2142_v0 = vpop.f32.mrf.mxu1  ;;  %v2081_v61 = vpop.f32.mrf.mxu0 }
 0x2a8   : > { %v1709_v25 = vadd.f32 %v2080_v13, %v3573_v44 }
 0x2a9   : > { %v2143_v36 = vpop.f32.mrf.mxu1  ;;  %v2082_v32 = vpop.f32.mrf.mxu0 }
 0x2aa   : > { %v2144_v15 = vadd.f32 %v2143_v36, %v2142_v0  ;;  %v2083_v14 = vadd.f32 %v2082_v32, %v2081_v61 }
 0x2ab   : > { %v2145_v34 = vpop.f32.mrf.mxu1 }
 0x2ac   : > { %v1806_v33 = vadd.f32 %v2144_v15, %v1709_v25  ;;  %v1712_v18 = vadd.f32 %v2083_v14, %v3573_v44 }
 0x2ad   : > { %v2146_v52 = vpop.f32.mrf.mxu1 }
 0x2ae   : > { %1832 = vst [vmem:[%s3579_s13 + $0x60] sm:$0xff] %v1806_v33  ;;  %v2147_v5 = vadd.f32 %v2146_v52, %v2145_v34 }
 0x2af   : > { %v2084_v48 = vpop.f32.mrf.mxu0 }
 0x2b0   : > { %v1809_v47 = vadd.f32 %v2147_v5, %v1712_v18 }
 0x2b1   : > { %v2085_v11 = vpop.f32.mrf.mxu0  ;;  %v2148_v29 = vpop.f32.mrf.mxu1 }
 0x2b2   : > { %1833 = vst [vmem:[%s3579_s13 + $0x68] sm:$0xff] %v1809_v47  ;;  %v2086_v57 = vadd.f32 %v2085_v11, %v2084_v48 }
 0x2b3   : > { %v2087_v56 = vpop.f32.mrf.mxu0  ;;  %v2149_v8 = vpop.f32.mrf.mxu1 }
 0x2b4   : > { %v1717_v49 = vadd.f32 %v2086_v57, %v3573_v44  ;;  %v2150_v2 = vadd.f32 %v2149_v8, %v2148_v29 }
 0x2b5   : > { %v2088_v3 = vpop.f32.mrf.mxu0  ;;  %v2151_v54 = vpop.f32.mrf.mxu1 }
 0x2b6   : > { %v2089_v43 = vadd.f32 %v2088_v3, %v2087_v56  ;;  %v1814_v39 = vadd.f32 %v2150_v2, %v1717_v49 }
 0x2b7   : > { %v2152_v9 = vpop.f32.mrf.mxu1 }
 0x2b8   : > { %v1720_v38 = vadd.f32 %v2089_v43, %v3573_v44  ;;  %1834 = vst [vmem:[%s3579_s13 + $0x70] sm:$0xff] %v1814_v39  ;;  %v2153_v4 = vadd.f32 %v2152_v9, %v2151_v54 }
 0x2ba   : > { %v1817_v30 = vadd.f32 %v2153_v4, %v1720_v38 }
 0x2bc   : > { %1835 = vst [vmem:[%s3579_s13 + $0x78] sm:$0xff] %v1817_v30 }
 0x2bd   : > { %2531 = shalt.err (!%p2528_p9)
}
 0x2be   : > { %s2532_s6 = scalar_lea.hbm %s3615_s11, 2048  ;;  %s2536_s10 = scalar_lea.hbm %s3666_s5, 4096 }
 0x2bf   : > { %p2533_p13 = scmp.ne.s32.totalorder %s3615_s11, %s2532_s6  ;;  %p2537_p4 = scmp.lt.s32.totalorder %s3615_s11, %s3666_s5 }
 0x2c0   : > { %p2538_p8 = scmp.lt.s32.totalorder %s2536_s10, %s2532_s6 }
 0x2c1   : > { %p2534_p5 = pnand %p2533_p13, %p3868_p10 }
 0x2c2   : > { %p2539_p7 = por %p2538_p8, %p2537_p4 }
 0x2c3   : > { %p2535_p0 = pneg %p2534_p5 }
 0x2c5   : > { %p2540_p11 = pnand %p2539_p7, %p2535_p0 }
 0x2c7   : > { %2543 = shalt.err (!%p2540_p11)
}
 0x2c8   : > { %s2599_s14 = smov 128   ;;  %s2600_s8 = smov 8  }
 0x2c9   : > { %2164 = dma.vmem_to_hbm [thread:$0]  (%p3868_p10), %s3617_s29, 2048, %s3615_s11, %s1837_s15, %s2599_s14, %s2599_s14, %s2600_s8  }
 0x2ca PF: > { %s1865_s9 = sand.u32 1, %s2574_s18   ;;  %p3869_p1 = scmp.ne.s32.totalorder %s3727_s25, 0 }
 0x2cb   : > { %p3870_p2 = scmp.ge.s32.totalorder %s2586_s21, 2  ;;  %s1866_s22 = scalar_lea.sflag [#allocation4], %s1865_s9 }
 0x2cd   : > { %p2178_p6 = pnand %p3870_p2, %p3869_p1 }
 0x2cf   : > { %p2179_p12 = pneg %p2178_p6 }
 0x2d1   : > { %2569 = dma.done.wait (%p2179_p12), %s1866_s22, 2048  }
 0x2d2   : > { %2571 = vsyncadd (%p2179_p12), %s1866_s22, 4294965248  ;;  %p19_p3 = scmp.ge.s32.totalorder %s2703_s17, 4   ;;  %s3871_s18 = smov %s2578_s19 }
 0x2d3   : > { %s3872_s19 = smov %s2582_s20  ;;  %s3873_s20 = smov %s2712_s28 }
 0x2d4   : > { %s3874_s21 = smov %s2703_s17  ;;  %21 = sbr.rel (!%p19_p3) target bundleno = 6 (0x6), region = 93 }
 0x2d9   :  { %1871 = vsyncpa [#allocation3], 1 }
 0x2da   :  { %1873 = vsyncpa [#allocation3 + $0x1], 1 }
 0x2db   :  { %1874 = vsyncpa [#allocation6], 1 }
 0x2dc   :  { %1875 = vsyncpa [#allocation4], 1 }
 0x2dd   :  { %1877 = vsyncpa [#allocation4 + $0x1], 1 }

</bundles_post_ra>
